<compile_context>
chip_gen: v7x
topology: tpu7x:2x2x1
jax: 0.10.0
libtpu: 0.0.40
codegen_flags: <defaults>
</compile_context>

<pallas_src>
import jax
import jax.numpy as jnp
from jax.experimental import pallas as pl
from jax.experimental.pallas import tpu as pltpu

EPS = 1e-5
LANE = 128


# --------------------------------- kernel -----------------------------------
def _bottleneck_kernel(xc_ref, xt_ref, xb_ref,
                       w1_ref, s1_ref, b1_ref,
                       w2_ref, s2_ref, b2_ref,
                       w3_ref, s3_ref, b3_ref, o_ref):
    i = pl.program_id(1)
    n_strips = pl.num_programs(1)
    _, TH, W, Cin = xc_ref.shape
    P = w1_ref.shape[1]
    Cout = w3_ref.shape[1]
    rows = (TH + 2) * W                       # strip rows incl. 1-row halos

    f32 = jnp.float32
    w1 = w1_ref[...]; w2 = w2_ref[...]; w3 = w3_ref[...]
    s1 = s1_ref[...]; b1 = b1_ref[...]
    s2 = s2_ref[...]; b2 = b2_ref[...]
    s3 = s3_ref[...]; b3 = b3_ref[...]

    xc = xc_ref[...].reshape(TH * W, Cin)     # bf16, current strip
    xt = xt_ref[...].reshape(W, Cin)          # bf16, halo row above
    xb = xb_ref[...].reshape(W, Cin)          # bf16, halo row below

    # ---- conv1 (1x1) + BN1 + ReLU ------------------------------------------
    def conv1(xm):
        t = jnp.dot(xm, w1, preferred_element_type=f32)
        return jnp.maximum(t * s1 + b1, 0.0)

    t1c = conv1(xc)                           # (TH*W, P)  f32
    t1t = conv1(xt)                           # (W, P)
    t1b = conv1(xb)                           # (W, P)
    # The 3x3 conv's zero padding lives in t1-space: kill halo rows that fall
    # outside the image (above the first strip / below the last strip).
    t1t = t1t * (i > 0).astype(f32)
    t1b = t1b * (i < n_strips - 1).astype(f32)
    t1h = jnp.concatenate([t1t, t1c, t1b], axis=0)            # (rows, P)

    # ---- conv2 (3x3, pad=1) as ONE K = 9P matmul ----------------------------
    # W-neighbours via sublane roll of the flattened rows by +/-1; the wrapped
    # rows land only in masked columns (w==0 / w==W-1), so a column mask
    # suffices — no padded buffer, no misaligned patch copies.
    w_pos = jax.lax.broadcasted_iota(jnp.int32, (rows, P), 0) % W
    t_left = jnp.where(w_pos >= 1, pltpu.roll(t1h, shift=1, axis=0), 0.0)
    t_right = jnp.where(w_pos < W - 1,
                        pltpu.roll(t1h, shift=rows - 1, axis=0), 0.0)  # == -1
    cat3 = jnp.concatenate([t_left, t1h, t_right], axis=-1)   # (rows, 3P)
    # H-neighbours via static, sublane-aligned slices of the halo strip.
    cat9 = jnp.concatenate(
        [cat3[dy * W:(dy + TH) * W] for dy in range(3)], axis=-1)   # (TH*W, 9P)

    t2 = jnp.dot(cat9.astype(jnp.bfloat16), w2, preferred_element_type=f32)
    t2 = jnp.maximum(t2 * s2 + b2, 0.0)                        # (TH*W, P)

    # ---- conv3 (1x1) + BN3 + ReLU -------------------------------------------
    t3 = jnp.dot(t2.astype(jnp.bfloat16), w3, preferred_element_type=f32)
    t3 = jnp.maximum(t3 * s3 + b3, 0.0)                        # (TH*W, Cout)

    # ---- identity residual + final ReLU -------------------------------------
    out = jnp.maximum(t3 + xc.astype(f32), 0.0)
    o_ref[...] = out.reshape(1, TH, W, Cout).astype(o_ref.dtype)


# --------------------------------- wrapper ----------------------------------
def _pad_axis(a, axis, mult=LANE):
    pad = (-a.shape[axis]) % mult
    if pad == 0:
        return a
    widths = [(0, 0)] * a.ndim
    widths[axis] = (0, pad)
    return jnp.pad(a, widths)


def bottleneck_forward(x_nchw, params, *, tile_h=None):
    """x_nchw: (N, C, H, W) like PyTorch; returns (N, C, H, W) float32."""
    w1, s1, b1, w2, s2, b2, w3, s3, b3 = params
    N, Cin, H, W = x_nchw.shape
    Cinp, Pp = w1.shape
    Coutp = w3.shape[1]
    assert Cinp == Coutp, "identity residual path requires in_planes == planes*4"
    assert w2.shape == (9 * Pp, Pp)
    assert W % 8 == 0, "W should be a multiple of 8 (sublane tile)"

    if tile_h is None:                        # largest divisor of H <= 16
        tile_h = min(H, 16)
        while H % tile_h:
            tile_h -= 1
    TH = tile_h
    n_strips = H // TH

    # NCHW -> NHWC, zero-pad channels to a lane multiple, bf16 for the MXU.
    x = jnp.transpose(x_nchw, (0, 2, 3, 1)).astype(jnp.float32)
    x = _pad_axis(x, 3).astype(jnp.bfloat16)                  # (N, H, W, Cinp)

    def const_spec(shape):
        return pl.BlockSpec(shape, lambda n, s, _nd=len(shape): (0,) * _nd)

    out_nhwc = pl.pallas_call(
        _bottleneck_kernel,
        out_shape=jax.ShapeDtypeStruct((N, H, W, Coutp), jnp.bfloat16),
        grid=(N, n_strips),
        in_specs=[
            # current row strip
            pl.BlockSpec((1, TH, W, Cinp), lambda n, s: (n, s, 0, 0)),
            # 1-row halo above / below (clamped at the image edges; the kernel
            # zeroes the corresponding t1 rows there).
            pl.BlockSpec((1, 1, W, Cinp),
                         lambda n, s: (n, jnp.maximum(s * TH - 1, 0), 0, 0)),
            pl.BlockSpec((1, 1, W, Cinp),
                         lambda n, s: (n, jnp.minimum(s * TH + TH, H - 1), 0, 0)),
            const_spec(w1.shape), const_spec(s1.shape), const_spec(b1.shape),
            const_spec(w2.shape), const_spec(s2.shape), const_spec(b2.shape),
            const_spec(w3.shape), const_spec(s3.shape), const_spec(b3.shape),
        ],
        out_specs=pl.BlockSpec((1, TH, W, Coutp), lambda n, s: (n, s, 0, 0)),
        compiler_params=pltpu.CompilerParams(
            dimension_semantics=("parallel", "parallel")),
    )(x, x, x, w1, s1, b1, w2, s2, b2, w3, s3, b3)

    out = out_nhwc[..., :Cin].astype(jnp.float32)             # drop lane padding
    return jnp.transpose(out, (0, 3, 1, 2))                   # -> NCHW


# ---------------- parameter construction (deterministic, synthetic) ----------
def init_params(key, in_planes, planes, expansion=4):
    ks = jax.random.split(key, 6)
    cout3 = planes * expansion
    # PyTorch conv weight layouts (OIHW), bias=False everywhere.
    conv1_w = 0.1 * jax.random.normal(ks[0], (planes, in_planes, 1, 1), jnp.float32)
    conv2_w = 0.1 * jax.random.normal(ks[1], (planes, planes, 3, 3), jnp.float32)
    conv3_w = 0.1 * jax.random.normal(ks[2], (cout3, planes, 1, 1), jnp.float32)

    def bn_params(k, c):
        k1, k2, k3, k4 = jax.random.split(k, 4)
        gamma = 1.0 + 0.1 * jax.random.normal(k1, (c,), jnp.float32)
        beta = 0.1 * jax.random.normal(k2, (c,), jnp.float32)
        mean = 0.1 * jax.random.normal(k3, (c,), jnp.float32)
        var = jnp.abs(jax.random.normal(k4, (c,), jnp.float32)) + 0.5
        return gamma, beta, mean, var

    return (conv1_w, conv2_w, conv3_w,
            bn_params(ks[3], planes), bn_params(ks[4], planes),
            bn_params(ks[5], cout3))


def fold_for_kernel(raw):
    """Fold BN into scale/shift, reshape weights for NHWC matmuls, zero-pad all
    channel dims to multiples of 128 (lane-dense), cast weights to bf16."""
    conv1_w, conv2_w, conv3_w, bn1, bn2, bn3 = raw

    def fold(bn):
        g, b, m, v = bn
        s = g / jnp.sqrt(v + EPS)
        return s, b - m * s

    s1, b1 = fold(bn1)
    s2, b2 = fold(bn2)
    s3, b3 = fold(bn3)

    w1 = conv1_w[:, :, 0, 0].T                                 # (Cin, P)
    w1 = _pad_axis(_pad_axis(w1, 0), 1).astype(jnp.bfloat16)

    w2 = jnp.transpose(conv2_w, (2, 3, 1, 0))                  # (3, 3, Pin, Pout)
    w2 = _pad_axis(_pad_axis(w2, 2), 3)
    pp = w2.shape[2]
    w2 = w2.reshape(9 * pp, w2.shape[3]).astype(jnp.bfloat16)  # tap-major (dy,dx,cin)

    w3 = conv3_w[:, :, 0, 0].T                                 # (P, Cout)
    w3 = _pad_axis(_pad_axis(w3, 0), 1).astype(jnp.bfloat16)

    def pad_vec(v):                                            # zero scale & shift
        return _pad_axis(v.reshape(1, -1), 1).astype(jnp.float32)

    return (w1, pad_vec(s1), pad_vec(b1),
            w2, pad_vec(s2), pad_vec(b2),
            w3, pad_vec(s3), pad_vec(b3))


# ---------------- plain-JAX reference (for verification) ---------------------
def reference_forward(x_nchw, raw):
    conv1_w, conv2_w, conv3_w, bn1, bn2, bn3 = raw

    def conv(x, w, pad):
        return jax.lax.conv_general_dilated(
            x, w, (1, 1), [(pad, pad), (pad, pad)],
            dimension_numbers=("NCHW", "OIHW", "NCHW"))

    def bn(x, p):
        g, b, m, v = (t[None, :, None, None] for t in p)
        return (x - m) / jnp.sqrt(v + EPS) * g + b

    relu = lambda t: jnp.maximum(t, 0.0)
    out = relu(bn(conv(x_nchw, conv1_w, 0), bn1))
    out = relu(bn(conv(out, conv2_w, 1), bn2))
    out = relu(bn(conv(out, conv3_w, 0), bn3))
    out = out + x_nchw
    return relu(out)


if __name__ == "__main__":
    key = jax.random.PRNGKey(0)
    kx, kp = jax.random.split(key)

    planes = 4
    in_planes = planes * 4        # identity residual path (stride=1, no downsample)
    N, H, W = 2, 8, 8

    x = jax.random.normal(kx, (N, in_planes, H, W), jnp.float32)   # NCHW input
    raw = init_params(kp, in_planes, planes)
    params = fold_for_kernel(raw)

    out = bottleneck_forward(x, params, tile_h=4)   # grid = (2 batches, 2 strips)
    out = jax.block_until_ready(out)
    assert out.shape == (N, in_planes, H, W)

    # Reference mirroring the kernel's precision policy (bf16 inputs/weights,
    # f32 accumulation + epilogue, bf16 output) so the check isolates kernel
    # correctness from the intentional bf16 cast.
    q = lambda a: a.astype(jnp.bfloat16).astype(jnp.float32)
    c1, c2, c3, bn1, bn2, bn3 = raw
    ref = q(reference_forward(q(x), (q(c1), q(c2), q(c3), bn1, bn2, bn3)))

    if not jnp.allclose(out, ref, atol=5e-2, rtol=5e-2):
        err = float(jnp.max(jnp.abs(out - ref)))
        raise AssertionError(
            f"Pallas kernel output mismatch vs reference (max abs err {err})")
    print("KERNEL_OK")
</pallas_src>

<mosaic_0001>
module attributes {stable_mosaic.version = 11 : i64} {
  func.func @_bottleneck_kernel(%arg0: i32, %arg1: i32, %arg2: memref<1x4x8x128xbf16, #tpu.memory_space<vmem>>, %arg3: memref<1x1x8x128xbf16, #tpu.memory_space<vmem>>, %arg4: memref<1x1x8x128xbf16, #tpu.memory_space<vmem>>, %arg5: memref<128x128xbf16, #tpu.memory_space<vmem>>, %arg6: memref<1x128xf32, #tpu.memory_space<vmem>>, %arg7: memref<1x128xf32, #tpu.memory_space<vmem>>, %arg8: memref<1152x128xbf16, #tpu.memory_space<vmem>>, %arg9: memref<1x128xf32, #tpu.memory_space<vmem>>, %arg10: memref<1x128xf32, #tpu.memory_space<vmem>>, %arg11: memref<128x128xbf16, #tpu.memory_space<vmem>>, %arg12: memref<1x128xf32, #tpu.memory_space<vmem>>, %arg13: memref<1x128xf32, #tpu.memory_space<vmem>>, %arg14: memref<1x4x8x128xbf16, #tpu.memory_space<vmem>>) attributes {dimension_semantics = [#tpu.dimension_semantics<parallel>, #tpu.dimension_semantics<parallel>], iteration_bounds = array<i64: 2, 2>, scalar_prefetch = 0 : i64, scratch_operands = 0 : i64, tpu.core_type = #tpu.core_type<tc>, window_params = [{transform_indices = @transform_0, window_bounds = array<i64: 1, 4, 8, 128>}, {transform_indices = @transform_1, window_bounds = array<i64: 1, 1, 8, 128>}, {transform_indices = @transform_2, window_bounds = array<i64: 1, 1, 8, 128>}, {pipeline_mode = #tpu.pipeline_mode<synchronous>, transform_indices = @transform_3, window_bounds = array<i64: 128, 128>}, {pipeline_mode = #tpu.pipeline_mode<synchronous>, transform_indices = @transform_4, window_bounds = array<i64: 1, 128>}, {pipeline_mode = #tpu.pipeline_mode<synchronous>, transform_indices = @transform_5, window_bounds = array<i64: 1, 128>}, {pipeline_mode = #tpu.pipeline_mode<synchronous>, transform_indices = @transform_6, window_bounds = array<i64: 1152, 128>}, {pipeline_mode = #tpu.pipeline_mode<synchronous>, transform_indices = @transform_7, window_bounds = array<i64: 1, 128>}, {pipeline_mode = #tpu.pipeline_mode<synchronous>, transform_indices = @transform_8, window_bounds = array<i64: 1, 128>}, {pipeline_mode = #tpu.pipeline_mode<synchronous>, transform_indices = @transform_9, window_bounds = array<i64: 128, 128>}, {pipeline_mode = #tpu.pipeline_mode<synchronous>, transform_indices = @transform_10, window_bounds = array<i64: 1, 128>}, {pipeline_mode = #tpu.pipeline_mode<synchronous>, transform_indices = @transform_11, window_bounds = array<i64: 1, 128>}, {transform_indices = @transform_12, window_bounds = array<i64: 1, 4, 8, 128>}]} {
    %c0 = arith.constant 0 : index
    %c0_0 = arith.constant 0 : index
    %0 = vector.load %arg5[%c0, %c0_0] : memref<128x128xbf16, #tpu.memory_space<vmem>>, vector<128x128xbf16>
    %c0_1 = arith.constant 0 : index
    %c0_2 = arith.constant 0 : index
    %1 = vector.load %arg8[%c0_1, %c0_2] : memref<1152x128xbf16, #tpu.memory_space<vmem>>, vector<1152x128xbf16>
    %c0_3 = arith.constant 0 : index
    %c0_4 = arith.constant 0 : index
    %2 = vector.load %arg11[%c0_3, %c0_4] : memref<128x128xbf16, #tpu.memory_space<vmem>>, vector<128x128xbf16>
    %c0_5 = arith.constant 0 : index
    %c0_6 = arith.constant 0 : index
    %3 = vector.load %arg6[%c0_5, %c0_6] : memref<1x128xf32, #tpu.memory_space<vmem>>, vector<1x128xf32>
    %c0_7 = arith.constant 0 : index
    %c0_8 = arith.constant 0 : index
    %4 = vector.load %arg7[%c0_7, %c0_8] : memref<1x128xf32, #tpu.memory_space<vmem>>, vector<1x128xf32>
    %c0_9 = arith.constant 0 : index
    %c0_10 = arith.constant 0 : index
    %5 = vector.load %arg9[%c0_9, %c0_10] : memref<1x128xf32, #tpu.memory_space<vmem>>, vector<1x128xf32>
    %c0_11 = arith.constant 0 : index
    %c0_12 = arith.constant 0 : index
    %6 = vector.load %arg10[%c0_11, %c0_12] : memref<1x128xf32, #tpu.memory_space<vmem>>, vector<1x128xf32>
    %c0_13 = arith.constant 0 : index
    %c0_14 = arith.constant 0 : index
    %7 = vector.load %arg12[%c0_13, %c0_14] : memref<1x128xf32, #tpu.memory_space<vmem>>, vector<1x128xf32>
    %c0_15 = arith.constant 0 : index
    %c0_16 = arith.constant 0 : index
    %8 = vector.load %arg13[%c0_15, %c0_16] : memref<1x128xf32, #tpu.memory_space<vmem>>, vector<1x128xf32>
    %c0_17 = arith.constant 0 : index
    %c0_18 = arith.constant 0 : index
    %c0_19 = arith.constant 0 : index
    %c0_20 = arith.constant 0 : index
    %9 = vector.load %arg2[%c0_17, %c0_18, %c0_19, %c0_20] : memref<1x4x8x128xbf16, #tpu.memory_space<vmem>>, vector<1x4x8x128xbf16>
    %10 = vector.shape_cast %9 : vector<1x4x8x128xbf16> to vector<32x128xbf16>
    %c0_21 = arith.constant 0 : index
    %c0_22 = arith.constant 0 : index
    %c0_23 = arith.constant 0 : index
    %c0_24 = arith.constant 0 : index
    %11 = vector.load %arg3[%c0_21, %c0_22, %c0_23, %c0_24] : memref<1x1x8x128xbf16, #tpu.memory_space<vmem>>, vector<1x1x8x128xbf16>
    %12 = vector.shape_cast %11 : vector<1x1x8x128xbf16> to vector<8x128xbf16>
    %c0_25 = arith.constant 0 : index
    %c0_26 = arith.constant 0 : index
    %c0_27 = arith.constant 0 : index
    %c0_28 = arith.constant 0 : index
    %13 = vector.load %arg4[%c0_25, %c0_26, %c0_27, %c0_28] : memref<1x1x8x128xbf16, #tpu.memory_space<vmem>>, vector<1x1x8x128xbf16>
    %14 = vector.shape_cast %13 : vector<1x1x8x128xbf16> to vector<8x128xbf16>
    %cst = arith.constant dense<0.000000e+00> : vector<32x128xf32>
    %15 = tpu.matmul %10, %0, %cst {dimension_numbers = #tpu.dot_dimension_numbers<[1], [0], [0], [1], [0, 0, 1, 1], [], []>} : vector<32x128xbf16>, vector<128x128xbf16>, vector<32x128xf32> -> vector<32x128xf32>
    %16 = vector.broadcast %3 : vector<1x128xf32> to vector<32x128xf32>
    %17 = arith.mulf %15, %16 : vector<32x128xf32>
    %18 = vector.broadcast %4 : vector<1x128xf32> to vector<32x128xf32>
    %19 = arith.addf %17, %18 : vector<32x128xf32>
    %cst_29 = arith.constant 0.000000e+00 : f32
    %20 = vector.broadcast %cst_29 : f32 to vector<32x128xf32>
    %21 = arith.maximumf %19, %20 : vector<32x128xf32>
    %cst_30 = arith.constant dense<0.000000e+00> : vector<8x128xf32>
    %22 = tpu.matmul %12, %0, %cst_30 {dimension_numbers = #tpu.dot_dimension_numbers<[1], [0], [0], [1], [0, 0, 1, 1], [], []>} : vector<8x128xbf16>, vector<128x128xbf16>, vector<8x128xf32> -> vector<8x128xf32>
    %23 = vector.broadcast %3 : vector<1x128xf32> to vector<8x128xf32>
    %24 = arith.mulf %22, %23 : vector<8x128xf32>
    %25 = vector.broadcast %4 : vector<1x128xf32> to vector<8x128xf32>
    %26 = arith.addf %24, %25 : vector<8x128xf32>
    %cst_31 = arith.constant 0.000000e+00 : f32
    %27 = vector.broadcast %cst_31 : f32 to vector<8x128xf32>
    %28 = arith.maximumf %26, %27 : vector<8x128xf32>
    %cst_32 = arith.constant dense<0.000000e+00> : vector<8x128xf32>
    %29 = tpu.matmul %14, %0, %cst_32 {dimension_numbers = #tpu.dot_dimension_numbers<[1], [0], [0], [1], [0, 0, 1, 1], [], []>} : vector<8x128xbf16>, vector<128x128xbf16>, vector<8x128xf32> -> vector<8x128xf32>
    %30 = vector.broadcast %3 : vector<1x128xf32> to vector<8x128xf32>
    %31 = arith.mulf %29, %30 : vector<8x128xf32>
    %32 = vector.broadcast %4 : vector<1x128xf32> to vector<8x128xf32>
    %33 = arith.addf %31, %32 : vector<8x128xf32>
    %cst_33 = arith.constant 0.000000e+00 : f32
    %34 = vector.broadcast %cst_33 : f32 to vector<8x128xf32>
    %35 = arith.maximumf %33, %34 : vector<8x128xf32>
    %c0_i32 = arith.constant 0 : i32
    %36 = arith.cmpi sgt, %arg1, %c0_i32 : i32
    %37 = arith.extui %36 : i1 to i32
    %38 = arith.sitofp %37 : i32 to f32
    %39 = vector.broadcast %38 : f32 to vector<8x128xf32>
    %40 = arith.mulf %28, %39 : vector<8x128xf32>
    %c1_i32 = arith.constant 1 : i32
    %41 = arith.cmpi slt, %arg1, %c1_i32 : i32
    %42 = arith.extui %41 : i1 to i32
    %43 = arith.sitofp %42 : i32 to f32
    %44 = vector.broadcast %43 : f32 to vector<8x128xf32>
    %45 = arith.mulf %35, %44 : vector<8x128xf32>
    %46 = tpu.concatenate %40, %21, %45 in 0 : vector<8x128xf32>, vector<32x128xf32>, vector<8x128xf32> -> vector<48x128xf32>
    %47 = tpu.iota {dimensions = array<i32: 0>} : vector<48x128xi32>
    %c8_i32 = arith.constant 8 : i32
    %c0_i32_34 = arith.constant 0 : i32
    %48 = arith.cmpi eq, %c8_i32, %c0_i32_34 : i32
    %c1_i32_35 = arith.constant 1 : i32
    %49 = arith.select %48, %c1_i32_35, %c8_i32 : i32
    %50 = vector.broadcast %49 : i32 to vector<48x128xi32>
    %51 = arith.remsi %47, %50 : vector<48x128xi32>
    %c0_i32_36 = arith.constant 0 : i32
    %52 = vector.broadcast %c0_i32_36 : i32 to vector<48x128xi32>
    %53 = arith.cmpi ne, %51, %52 : vector<48x128xi32>
    %c0_i32_37 = arith.constant 0 : i32
    %54 = vector.broadcast %c0_i32_37 : i32 to vector<48x128xi32>
    %55 = arith.cmpi slt, %51, %54 : vector<48x128xi32>
    %c0_i32_38 = arith.constant 0 : i32
    %56 = arith.cmpi slt, %49, %c0_i32_38 : i32
    %57 = vector.broadcast %56 : i1 to vector<48x128xi1>
    %58 = vector.broadcast %57 : vector<48x128xi1> to vector<48x128xi1>
    %59 = arith.xori %55, %58 : vector<48x128xi1>
    %60 = arith.andi %59, %53 : vector<48x128xi1>
    %61 = vector.broadcast %49 : i32 to vector<48x128xi32>
    %62 = arith.addi %51, %61 : vector<48x128xi32>
    %63 = arith.select %60, %62, %51 : vector<48x128xi1>, vector<48x128xi32>
    %c1_i32_39 = arith.constant 1 : i32
    %64 = vector.broadcast %c1_i32_39 : i32 to vector<48x128xi32>
    %65 = arith.cmpi sge, %63, %64 : vector<48x128xi32>
    %c1_i32_40 = arith.constant 1 : i32
    %66 = tpu.dynamic_rotate %46 by %c1_i32_40 dim 0 : vector<48x128xf32>, i32 -> vector<48x128xf32>
    %cst_41 = arith.constant 0.000000e+00 : f32
    %67 = vector.broadcast %cst_41 : f32 to vector<48x128xf32>
    %68 = arith.select %65, %66, %67 : vector<48x128xi1>, vector<48x128xf32>
    %c7_i32 = arith.constant 7 : i32
    %69 = vector.broadcast %c7_i32 : i32 to vector<48x128xi32>
    %70 = arith.cmpi slt, %63, %69 : vector<48x128xi32>
    %c47_i32 = arith.constant 47 : i32
    %71 = tpu.dynamic_rotate %46 by %c47_i32 dim 0 : vector<48x128xf32>, i32 -> vector<48x128xf32>
    %cst_42 = arith.constant 0.000000e+00 : f32
    %72 = vector.broadcast %cst_42 : f32 to vector<48x128xf32>
    %73 = arith.select %70, %71, %72 : vector<48x128xi1>, vector<48x128xf32>
    %74 = tpu.concatenate %68, %46, %73 in 1 : vector<48x128xf32>, vector<48x128xf32>, vector<48x128xf32> -> vector<48x384xf32>
    %75 = vector.extract_strided_slice %74 {offsets = [0, 0], sizes = [32, 384], strides = [1, 1]} : vector<48x384xf32> to vector<32x384xf32>
    %76 = vector.extract_strided_slice %74 {offsets = [8, 0], sizes = [32, 384], strides = [1, 1]} : vector<48x384xf32> to vector<32x384xf32>
    %77 = vector.extract_strided_slice %74 {offsets = [16, 0], sizes = [32, 384], strides = [1, 1]} : vector<48x384xf32> to vector<32x384xf32>
    %78 = tpu.concatenate %75, %76, %77 in 1 : vector<32x384xf32>, vector<32x384xf32>, vector<32x384xf32> -> vector<32x1152xf32>
    %79 = arith.truncf %78 : vector<32x1152xf32> to vector<32x1152xbf16>
    %cst_43 = arith.constant dense<0.000000e+00> : vector<32x128xf32>
    %80 = tpu.matmul %79, %1, %cst_43 {dimension_numbers = #tpu.dot_dimension_numbers<[1], [0], [0], [1], [0, 0, 1, 1], [], []>} : vector<32x1152xbf16>, vector<1152x128xbf16>, vector<32x128xf32> -> vector<32x128xf32>
    %81 = vector.broadcast %5 : vector<1x128xf32> to vector<32x128xf32>
    %82 = arith.mulf %80, %81 : vector<32x128xf32>
    %83 = vector.broadcast %6 : vector<1x128xf32> to vector<32x128xf32>
    %84 = arith.addf %82, %83 : vector<32x128xf32>
    %cst_44 = arith.constant 0.000000e+00 : f32
    %85 = vector.broadcast %cst_44 : f32 to vector<32x128xf32>
    %86 = arith.maximumf %84, %85 : vector<32x128xf32>
    %87 = arith.truncf %86 : vector<32x128xf32> to vector<32x128xbf16>
    %cst_45 = arith.constant dense<0.000000e+00> : vector<32x128xf32>
    %88 = tpu.matmul %87, %2, %cst_45 {dimension_numbers = #tpu.dot_dimension_numbers<[1], [0], [0], [1], [0, 0, 1, 1], [], []>} : vector<32x128xbf16>, vector<128x128xbf16>, vector<32x128xf32> -> vector<32x128xf32>
    %89 = vector.broadcast %7 : vector<1x128xf32> to vector<32x128xf32>
    %90 = arith.mulf %88, %89 : vector<32x128xf32>
    %91 = vector.broadcast %8 : vector<1x128xf32> to vector<32x128xf32>
    %92 = arith.addf %90, %91 : vector<32x128xf32>
    %cst_46 = arith.constant 0.000000e+00 : f32
    %93 = vector.broadcast %cst_46 : f32 to vector<32x128xf32>
    %94 = arith.maximumf %92, %93 : vector<32x128xf32>
    %95 = arith.extf %10 : vector<32x128xbf16> to vector<32x128xf32>
    %96 = arith.addf %94, %95 : vector<32x128xf32>
    %cst_47 = arith.constant 0.000000e+00 : f32
    %97 = vector.broadcast %cst_47 : f32 to vector<32x128xf32>
    %98 = arith.maximumf %96, %97 : vector<32x128xf32>
    %99 = vector.shape_cast %98 : vector<32x128xf32> to vector<1x4x8x128xf32>
    %100 = arith.truncf %99 : vector<1x4x8x128xf32> to vector<1x4x8x128xbf16>
    %c0_48 = arith.constant 0 : index
    %c0_49 = arith.constant 0 : index
    %c0_50 = arith.constant 0 : index
    %c0_51 = arith.constant 0 : index
    %101 = vector.load %arg14[%c0_48, %c0_49, %c0_50, %c0_51] : memref<1x4x8x128xbf16, #tpu.memory_space<vmem>>, vector<1x4x8x128xbf16>
    tpu.vector_store %arg14[%c0_48, %c0_49, %c0_50, %c0_51], %100 {strides = array<i32>} : memref<1x4x8x128xbf16, #tpu.memory_space<vmem>>, vector<1x4x8x128xbf16>,
    return
  }
  func.func @transform_0(%arg0: i32, %arg1: i32) -> (i32, i32, i32, i32) {
    %c0_i32 = arith.constant 0 : i32
    %c0_i32_0 = arith.constant 0 : i32
    %c0_i32_1 = arith.constant 0 : i32
    return %arg0, %arg1, %c0_i32, %c0_i32_0 : i32, i32, i32, i32
  }
  func.func @transform_1(%arg0: i32, %arg1: i32) -> (i32, i32, i32, i32) {
    %c4_i32 = arith.constant 4 : i32
    %0 = arith.muli %arg1, %c4_i32 : i32
    %c1_i32 = arith.constant 1 : i32
    %1 = arith.subi %0, %c1_i32 : i32
    %c0_i32 = arith.constant 0 : i32
    %2 = arith.maxsi %1, %c0_i32 : i32
    %c0_i32_0 = arith.constant 0 : i32
    %c0_i32_1 = arith.constant 0 : i32
    %c0_i32_2 = arith.constant 0 : i32
    return %arg0, %2, %c0_i32_0, %c0_i32_1 : i32, i32, i32, i32
  }
  func.func @transform_2(%arg0: i32, %arg1: i32) -> (i32, i32, i32, i32) {
    %c4_i32 = arith.constant 4 : i32
    %0 = arith.muli %arg1, %c4_i32 : i32
    %c4_i32_0 = arith.constant 4 : i32
    %1 = arith.addi %0, %c4_i32_0 : i32
    %c7_i32 = arith.constant 7 : i32
    %2 = arith.minsi %1, %c7_i32 : i32
    %c0_i32 = arith.constant 0 : i32
    %c0_i32_1 = arith.constant 0 : i32
    %c0_i32_2 = arith.constant 0 : i32
    return %arg0, %2, %c0_i32, %c0_i32_1 : i32, i32, i32, i32
  }
  func.func @transform_3(%arg0: i32, %arg1: i32) -> (i32, i32) {
    %c0_i32 = arith.constant 0 : i32
    %c0_i32_0 = arith.constant 0 : i32
    %c0_i32_1 = arith.constant 0 : i32
    return %c0_i32, %c0_i32_0 : i32, i32
  }
  func.func @transform_4(%arg0: i32, %arg1: i32) -> (i32, i32) {
    %c0_i32 = arith.constant 0 : i32
    %c0_i32_0 = arith.constant 0 : i32
    %c0_i32_1 = arith.constant 0 : i32
    return %c0_i32, %c0_i32_0 : i32, i32
  }
  func.func @transform_5(%arg0: i32, %arg1: i32) -> (i32, i32) {
    %c0_i32 = arith.constant 0 : i32
    %c0_i32_0 = arith.constant 0 : i32
    %c0_i32_1 = arith.constant 0 : i32
    return %c0_i32, %c0_i32_0 : i32, i32
  }
  func.func @transform_6(%arg0: i32, %arg1: i32) -> (i32, i32) {
    %c0_i32 = arith.constant 0 : i32
    %c0_i32_0 = arith.constant 0 : i32
    %c0_i32_1 = arith.constant 0 : i32
    return %c0_i32, %c0_i32_0 : i32, i32
  }
  func.func @transform_7(%arg0: i32, %arg1: i32) -> (i32, i32) {
    %c0_i32 = arith.constant 0 : i32
    %c0_i32_0 = arith.constant 0 : i32
    %c0_i32_1 = arith.constant 0 : i32
    return %c0_i32, %c0_i32_0 : i32, i32
  }
  func.func @transform_8(%arg0: i32, %arg1: i32) -> (i32, i32) {
    %c0_i32 = arith.constant 0 : i32
    %c0_i32_0 = arith.constant 0 : i32
    %c0_i32_1 = arith.constant 0 : i32
    return %c0_i32, %c0_i32_0 : i32, i32
  }
  func.func @transform_9(%arg0: i32, %arg1: i32) -> (i32, i32) {
    %c0_i32 = arith.constant 0 : i32
    %c0_i32_0 = arith.constant 0 : i32
    %c0_i32_1 = arith.constant 0 : i32
    return %c0_i32, %c0_i32_0 : i32, i32
  }
  func.func @transform_10(%arg0: i32, %arg1: i32) -> (i32, i32) {
    %c0_i32 = arith.constant 0 : i32
    %c0_i32_0 = arith.constant 0 : i32
    %c0_i32_1 = arith.constant 0 : i32
    return %c0_i32, %c0_i32_0 : i32, i32
  }
  func.func @transform_11(%arg0: i32, %arg1: i32) -> (i32, i32) {
    %c0_i32 = arith.constant 0 : i32
    %c0_i32_0 = arith.constant 0 : i32
    %c0_i32_1 = arith.constant 0 : i32
    return %c0_i32, %c0_i32_0 : i32, i32
  }
  func.func @transform_12(%arg0: i32, %arg1: i32) -> (i32, i32, i32, i32) {
    %c0_i32 = arith.constant 0 : i32
    %c0_i32_0 = arith.constant 0 : i32
    %c0_i32_1 = arith.constant 0 : i32
    return %arg0, %arg1, %c0_i32, %c0_i32_0 : i32, i32, i32, i32
  }
}

</mosaic_0001>

<bundles_post_ra>
// kernel: tpu_custom_call.1
= control target key start
LH: loop header
LB: loop body
LE: loop exit
PB: predicated region body
PF: predicated region fallthrough
CT: control target
= control target key end

     0   :  { %s4161_s0 = inlined_call_operand.hbm [shape: bf16[2,8,8,128], index: 0, kind: input, shape index: {}]   ;;  %s4162_s1 = inlined_call_operand.hbm [shape: bf16[2,8,8,128], index: 1, kind: input, shape index: {}]   ;;  %s4163_s2 = inlined_call_operand.hbm [shape: bf16[2,8,8,128], index: 2, kind: input, shape index: {}]   ;;  %s4164_s3 = inlined_call_operand.hbm [shape: bf16[128,128], index: 3, kind: input, shape index: {}]   ;;  %s4165_s4 = inlined_call_operand.vmem [shape: f32[1,128], index: 4, kind: input, shape index: {}]   ;;  %s4166_s5 = inlined_call_operand.vmem [shape: f32[1,128], index: 5, kind: input, shape index: {}]   ;;  %s4167_s6 = inlined_call_operand.hbm [shape: bf16[1152,128], index: 6, kind: input, shape index: {}]   ;;  %s4168_s7 = inlined_call_operand.vmem [shape: f32[1,128], index: 7, kind: input, shape index: {}]   ;;  %s4169_s8 = inlined_call_operand.vmem [shape: f32[1,128], index: 8, kind: input, shape index: {}]   ;;  %s4170_s9 = inlined_call_operand.hbm [shape: bf16[128,128], index: 9, kind: input, shape index: {}]   ;;  %s4171_s10 = inlined_call_operand.vmem [shape: f32[1,128], index: 10, kind: input, shape index: {}]   ;;  %s4172_s11 = inlined_call_operand.vmem [shape: f32[1,128], index: 11, kind: input, shape index: {}]   ;;  %s4173_s12 = inlined_call_operand.hbm [shape: bf16[2,8,8,128], index: 12, kind: output, shape index: {}]  }
   0x1   :  { %4201 = sst [smem:[#allocation33_spill]] %s4161_s0 }
   0x2   :  { %4202 = sst [smem:[#allocation34_spill]] %s4162_s1 }
   0x3   :  { %4203 = sst [smem:[#allocation35_spill]] %s4163_s2 }
   0x4   :  { %4204 = sst [smem:[#allocation36_spill]] %s4164_s3 }
   0x5   :  { %4205 = sst [smem:[#allocation37_spill]] %s4165_s4 }
   0x6   :  { %4206 = sst [smem:[#allocation38_spill]] %s4166_s5 }
   0x7   :  { %4207 = sst [smem:[#allocation39_spill]] %s4167_s6 }
   0x8   :  { %4208 = sst [smem:[#allocation40_spill]] %s4168_s7 }
   0x9   :  { %4209 = sst [smem:[#allocation41_spill]] %s4169_s8 }
   0xa   :  { %4210 = sst [smem:[#allocation42_spill]] %s4170_s9 }
   0xb   :  { %4211 = sst [smem:[#allocation43_spill]] %s4171_s10 }
   0xc   :  { %4212 = sst [smem:[#allocation44_spill]] %s4172_s11 }
   0xd   :  { %4213 = sst [smem:[#allocation45_spill]] %s4173_s12 }
   0xe   :  { %17 = vsyncpa [#allocation3], 0 }
   0xf   :  { %19 = vsyncpa [#allocation3 + $0x1], 0 }
  0x10   :  { %20 = vsyncpa [#allocation6], 0 }
  0x11   :  { %22 = vsyncpa [#allocation6 + $0x1], 0 }
  0x12   :  { %23 = vsyncpa [#allocation9], 0 }
  0x13   :  { %24 = vsyncpa [#allocation12], 0 }
  0x14   :  { %25 = vsyncpa [#allocation4], 0 }
  0x15   :  { %27 = vsyncpa [#allocation4 + $0x1], 0  ;;  %s3321_s21 = smov 0   ;;  %s3323_s22 = smov 0  }
  0x16   :  { %s3325_s23 = smov 0   ;;  %s3327_s24 = smov 0  }
  0x17   :  { %s3329_s25 = smov 0   ;;  %s3331_s26 = smov 0  }
  0x18   :  { %s3333_s27 = smov 0   ;;  %s3335_s28 = smov 0  }
  0x19   :  { %s3337_s29 = smov 0   ;;  %s3339_s30 = smov 0  }
  0x1a   :  { %s3341_s13 = smov 0   ;;  %s3343_s14 = smov 0  }
  0x1b   :  { %s3345_s15 = smov 0   ;;  %s3347_s16 = smov 0  }
  0x1c LB: > { %4214 = sst [smem:[#allocation20_spill]] %s3189_s21  ;;  %s3392_s17 = sadd.s32 4294967295, %s3241_s16   ;;  %s3241_s16 = sphi %s3347_s16, %s33_s16   ;;  %s3237_s15 = sphi %s3345_s15, %s4314_s15   ;;  %s3233_s14 = sphi %s3343_s14, %s4313_s14   ;;  %s3229_s13 = sphi %s3341_s13, %s4312_s13   ;;  %s3225_s30 = sphi %s3339_s30, %s4311_s30   ;;  %s3221_s29 = sphi %s3337_s29, %s4322_s29   ;;  %s3217_s28 = sphi %s3335_s28, %s4321_s28   ;;  %s3213_s27 = sphi %s3333_s27, %s4320_s27   ;;  %s3209_s26 = sphi %s3331_s26, %s4319_s26   ;;  %s3205_s25 = sphi %s3329_s25, %s4318_s25   ;;  %s3201_s24 = sphi %s3327_s24, %s4309_s24   ;;  %s3197_s23 = sphi %s3325_s23, %s4317_s23   ;;  %s3193_s22 = sphi %s3323_s22, %s4316_s22   ;;  %s3189_s21 = sphi %s3321_s21, %s4315_s21  }
  0x1d   : > { %4215 = sst [smem:[#allocation21_spill]] %s3193_s22  ;;  %p2203_p0 = scmp.ge.s32.totalorder %s3241_s16, 1 }
  0x1e   : > { %4216 = sst [smem:[#allocation22_spill]] %s3197_s23  ;;  %p4175_p1 = scmp.eq.s32.totalorder %s3392_s17, 0 }
  0x1f   : > { %4217 = sst [smem:[#allocation23_spill]] %s3205_s25  ;;  %p367_p3 = scmp.lt.s32.totalorder %s3241_s16, 5 }
  0x20   : > { %4218 = sst [smem:[#allocation24_spill]] %s3225_s30  ;;  %s3243_s19 = smov [#allocation8]  }
  0x21   : > { %4219 = sst [smem:[#allocation25_spill]] %s3229_s13  ;;  %p3398_p4 = pnand %p2203_p0, %p367_p3 }
  0x22   : > { %4220 = sst [smem:[#allocation26_spill]] %s3233_s14  ;;  %s379_s20 = sshll.u32 %s3243_s19, 4  ;;  %s380_s20 = int_to_ptr.vmem [resolvable:$true] %s379_s20 }
  0x23   : > { %4221 = sst [smem:[#allocation27_spill]] %s3237_s15  ;;  %p2658_p5 = pneg %p3398_p4 }
  0x24   : > { %s4222_s18 = scalar_select %p3398_p4, 1, 0 }
  0x25   : > { %p3406_p6 = pnand %p2658_p5, %p4175_p1  ;;  %s4225_s3 = sld [smem:[#allocation36_spill]] }
  0x26   : > { %4223 = sst [smem:[#allocation28_spill]] %s4222_s18 }
  0x27   : > { %s4224_s12 = scalar_select %p3406_p6, 1, 0 }
  0x28   : > { %p3418_p8 = pneg %p3406_p6 }
  0x2b   : > { %s2905_s10 = scalar_lea.hbm %s4225_s3, 1024 }
  0x2c   : > { %p2906_p7 = scmp.ne.s32.totalorder %s4225_s3, %s2905_s10  ;;  %p2912_p11 = scmp.lt.u32.totalorder %s2905_s10, %s4225_s3 }
  0x2e   : > { %p2908_p9 = pnand %p3418_p8, %p2906_p7 }
  0x30   : > { %p2909_p10 = pneg %p2908_p9 }
  0x32   : > { %p2914_p12 = pnand %p2912_p11, %p2909_p10 }
  0x34   : > { %2917 = shalt.err (!%p2914_p12)
}
  0x35   : > { %s2918_s11 = scalar_lea.vmem %s380_s20, 1024  ;;  %p2926_p5 = scmp.lt.s32.totalorder %s380_s20, %s380_s20 }
  0x36   : > { %p2919_p13 = scmp.ne.s32.totalorder %s380_s20, %s2918_s11  ;;  %p2927_p2 = scmp.lt.s32.totalorder %s2918_s11, %s2918_s11 }
  0x38   : > { %p2921_p0 = pnand %p2919_p13, %p3418_p8  ;;  %p2928_p1 = por %p2927_p2, %p2926_p5 }
  0x3a   : > { %p2922_p3 = pneg %p2921_p0 }
  0x3c   : > { %p2929_p4 = pnand %p2928_p1, %p2922_p3 }
  0x3e   : > { %2932 = shalt.err (!%p2929_p4)
}
  0x3f   : > { %s4179_s7 = smov 64   ;;  %s4181_s4 = smov 4  }
  0x40   : > { %2661 = dma.hbm_to_vmem [thread:$0]  (!%p3406_p6), %s4225_s3, 1024, %s380_s20, [#allocation9], %s4179_s7, %s4179_s7, %s4181_s4  }
  0x41   : > { %s42_s10 = sadd.s32 1, %s3233_s14  ;;  %s45_s13 = sadd.s32 1, %s3237_s15 }
  0x42   : > { %p43_p1 = scmp.ge.s32.totalorder %s42_s10, 2  ;;  %p4195_p2 = scmp.eq.s32.totalorder %s3241_s16, 0 }
  0x43   : > { %s3441_s11 = sshll.u32 %s3233_s14, 2  ;;  %s90_s30 = sadd.s32 1, %s3209_s26 }
  0x44   : > { %s4324_s10 = smov (%p43_p1, %s42_s10), 0  ;;  %s4326_s13 = smov (!%p43_p1, %s45_s13), %s3237_s15 }
  0x45   : > { %4227 = sst [smem:[#allocation29_spill]] %s4324_s10  ;;  %s50_s18 = ssub.s32 %s3233_s14, %s4324_s10 }
  0x46   : > { %s2198_s5 = sadd.s32 4294967295, %s3441_s11  ;;  %p47_p4 = scmp.ge.s32.totalorder %s4326_s13, 2 }
  0x47   : > { %p79_p7 = scmp.gt.s32.totalorder %s2198_s5, 0  ;;  %s2199_s20 = sshll.u32 %s4324_s10, 2 }
  0x48   : > { %p97_p9 = scmp.ne.s32.totalorder %s3209_s26, %s3205_s25  ;;  %s4328_s13 = smov (%p47_p4, %s4326_s13), 0 }
  0x49   : > { %4228 = sst [smem:[#allocation30_spill]] %s4328_s13  ;;  %s4330_s5 = smov (!%p79_p7, %s2198_s5), 0 }
  0x4a   : > { %s3457_s8 = ssub.s32 %s3237_s15, %s4328_s13  ;;  %s2200_s7 = sadd.s32 4294967295, %s2199_s20 }
  0x4b   : > { %4229 = sst [smem:[#allocation31_spill]] %s3457_s8  ;;  %s3460_s4 = sor.u32 %s50_s18, %s3457_s8 }
  0x4c   : > { %p83_p10 = scmp.gt.s32.totalorder %s2200_s7, 0  ;;  %p3465_p12 = por %p97_p9, %p4195_p2 }
  0x4d   : > { %p103_p13 = scmp.ne.s32.totalorder %s3205_s25, %s3201_s24  ;;  %s3471_s13 = sadd.s32 4, %s2199_s20 }
  0x4e   : > { %s4332_s7 = smov (!%p83_p10, %s2200_s7), 0  ;;  %4231 = sst [smem:[#allocation32_spill]] %s3471_s13 }
  0x4f   : > { %s86_s10 = ssub.s32 %s4330_s5, %s4332_s7  ;;  %p4232_p3 = scmp.eq.s32.totalorder %s3392_s17, 0 }
  0x50   : > { %s87_s18 = sor.u32 %s86_s10, %s3457_s8  ;;  %p4194_p4 = scmp.lt.s32.totalorder %s3241_s16, 4 }
  0x51   : > { %p3477_p5 = por %p103_p13, %p4232_p3  ;;  %p88_p1 = scmp.eq.s32.totalorder %s87_s18, 0 }
  0x52   : > { %s3483_s2 = sshll.u32 %s3237_s15, 3  ;;  %s460_s24 = sand.u32 1, %s3241_s16  }
  0x53   : > { %s4233_s14 = scalar_select %p3477_p5, 1, 0 }
  0x54   : > { %s3487_s20 = scalar_select %p88_p1, %s3209_s26, %s90_s30  }
  0x55   : > { %s462_s7 = sand.u32 1, %s3209_s26   ;;  %s473_s21 = sadd.s32 %s3483_s2, %s4330_s5 }
  0x56   : > { %s2212_s22 = sshll.u32 %s462_s7, 2  ;;  %s2216_s13 = sshll.u32 %s473_s21, 6 }
  0x57   : > { %s4234_s1 = sld [smem:[#allocation34_spill]]  ;;  %s464_s18 = scalar_lea.vmem [#allocation5], %s2212_s22 }
  0x58   : > { %s477_s15 = sshll.u32 %s464_s18, 4  ;;  %p3502_p7 = pnand %p4194_p4, %p3465_p12  ;;  %s3506_s15 = int_to_ptr.vmem [resolvable:$true] %s477_s15 }
  0x59   : > { %s3246_s21 = smov [#allocation10]  }
  0x5a   : > { %s3508_s5 = sshll.u32 %s3246_s21, 4  ;;  %p2935_p10 = pneg %p3502_p7  ;;  %s399_s5 = int_to_ptr.vmem [resolvable:$true] %s3508_s5 }
  0x5d   : > { %s3496_s23 = scalar_lea.hbm %s4234_s1, %s2216_s13  ;;  %s3510_s13 = scalar_lea.sflag [#allocation6], %s460_s24 }
  0x5e   : > { %s2933_s8 = scalar_lea.hbm %s3496_s23, 64  ;;  %s2938_s7 = scalar_lea.hbm %s4234_s1, 1024 }
  0x5f   : > { %p2934_p9 = scmp.ne.s32.totalorder %s3496_s23, %s2933_s8  ;;  %p2939_p3 = scmp.lt.u32.totalorder %s3496_s23, %s4234_s1 }
  0x60   : > { %p2940_p1 = scmp.lt.u32.totalorder %s2938_s7, %s2933_s8  ;;  %p2942_p4 = scmp.lt.u32.totalorder %s2933_s8, %s3496_s23 }
  0x61   : > { %p2936_p13 = pnand %p2935_p10, %p2934_p9 }
  0x62   : > { %p2941_p0 = por %p2940_p1, %p2939_p3 }
  0x63   : > { %p2937_p12 = pneg %p2936_p13 }
  0x64   : > { %p2943_p2 = por %p2942_p4, %p2941_p0 }
  0x66   : > { %p2944_p11 = pnand %p2943_p2, %p2937_p12 }
  0x68   : > { %2947 = shalt.err (!%p2944_p11)
}
  0x69   : > { %s2948_s24 = scalar_lea.vmem %s3506_s15, 64  ;;  %s3247_s21 = smov [#allocation5]  }
  0x6a   : > { %p2949_p9 = scmp.ne.s32.totalorder %s3506_s15, %s2948_s24  ;;  %s2953_s3 = sshll.u32 %s3247_s21, 4  ;;  %s2954_s3 = int_to_ptr.vmem [resolvable:$false] %s2953_s3 }
  0x6b   : > { %s2955_s22 = scalar_lea.vmem %s2954_s3, 128  ;;  %p2956_p6 = scmp.lt.s32.totalorder %s3506_s15, %s2954_s3 }
  0x6c   : > { %p2951_p13 = pnand %p2949_p9, %p2935_p10  ;;  %p2957_p3 = scmp.lt.s32.totalorder %s2955_s22, %s2948_s24 }
  0x6e   : > { %p2952_p5 = pneg %p2951_p13  ;;  %p2958_p1 = por %p2957_p3, %p2956_p6 }
  0x70   : > { %p2959_p0 = pnand %p2958_p1, %p2952_p5 }
  0x72   : > { %2962 = shalt.err (!%p2959_p0)
}
  0x73   : > { %2674 = dma.hbm_to_vmem [thread:$0]  (!%p3502_p7), %s3496_s23, 64, %s3506_s15, %s3510_s13  }
  0x74   : > { %s4236_s6 = sld [smem:[#allocation39_spill]] }
  0x7a   : > { %s2963_s10 = scalar_lea.hbm %s4236_s6, 9216 }
  0x7b   : > { %p2964_p2 = scmp.ne.s32.totalorder %s4236_s6, %s2963_s10  ;;  %p2970_p5 = scmp.lt.u32.totalorder %s2963_s10, %s4236_s6 }
  0x7d   : > { %p2966_p6 = pnand %p2964_p2, %p3418_p8 }
  0x7f   : > { %p2967_p11 = pneg %p2966_p6 }
  0x81   : > { %p2972_p4 = pnand %p2970_p5, %p2967_p11 }
  0x83   : > { %2975 = shalt.err (!%p2972_p4)
}
  0x84   : > { %s2976_s3 = scalar_lea.vmem %s399_s5, 9216  ;;  %p2984_p9 = scmp.lt.s32.totalorder %s399_s5, %s399_s5 }
  0x85   : > { %p2977_p7 = scmp.ne.s32.totalorder %s399_s5, %s2976_s3  ;;  %p2985_p13 = scmp.lt.s32.totalorder %s2976_s3, %s2976_s3 }
  0x87   : > { %p2979_p10 = pnand %p2977_p7, %p3418_p8  ;;  %p2986_p3 = por %p2985_p13, %p2984_p9 }
  0x89   : > { %p2980_p12 = pneg %p2979_p10 }
  0x8b   : > { %p2987_p1 = pnand %p2986_p3, %p2980_p12 }
  0x8d   : > { %2990 = shalt.err (!%p2987_p1)
}
  0x8e   : > { %p4237_p0 = scmp.ne.s32.totalorder %s4224_s12, 0  ;;  %s4238_s23 = smov 4  }
  0x8f   : > { %s4239_s15 = smov 64   ;;  %s3248_s7 = smov [#allocation11]  }
  0x90   : > { %2664 = dma.hbm_to_vmem [thread:$0]  (!%p4237_p0), %s4236_s6, 9216, %s399_s5, [#allocation9], %s4239_s15, %s4239_s15, %s4238_s23  }
  0x91   : > { %s417_s10 = sshll.u32 %s3248_s7, 4  ;;  %s4240_s9 = sld [smem:[#allocation42_spill]]  ;;  %s418_s10 = int_to_ptr.vmem [resolvable:$true] %s417_s10 }
  0x97   : > { %s2991_s24 = scalar_lea.hbm %s4240_s9, 1024 }
  0x98   : > { %p2992_p2 = scmp.ne.s32.totalorder %s4240_s9, %s2991_s24  ;;  %p2998_p5 = scmp.lt.u32.totalorder %s2991_s24, %s4240_s9 }
  0x9a   : > { %p2994_p6 = pnand %p2992_p2, %p3418_p8 }
  0x9c   : > { %p2995_p11 = pneg %p2994_p6 }
  0x9e   : > { %p3000_p4 = pnand %p2998_p5, %p2995_p11 }
  0xa0   : > { %3003 = shalt.err (!%p3000_p4)
}
  0xa1   : > { %s3004_s5 = scalar_lea.vmem %s418_s10, 1024  ;;  %p3012_p9 = scmp.lt.s32.totalorder %s418_s10, %s418_s10 }
  0xa2   : > { %p3005_p7 = scmp.ne.s32.totalorder %s418_s10, %s3004_s5  ;;  %p3013_p13 = scmp.lt.s32.totalorder %s3004_s5, %s3004_s5 }
  0xa4   : > { %p3007_p10 = pnand %p3005_p7, %p3418_p8  ;;  %p3014_p3 = por %p3013_p13, %p3012_p9 }
  0xa6   : > { %p3008_p12 = pneg %p3007_p10 }
  0xa8   : > { %p3015_p1 = pnand %p3014_p3, %p3008_p12 }
  0xaa   : > { %3018 = shalt.err (!%p3015_p1)
}
  0xab   : > { %2667 = dma.hbm_to_vmem [thread:$0]  (!%p4237_p0), %s4240_s9, 1024, %s418_s10, [#allocation12], %s4239_s15, %s4239_s15, %s4238_s23  }
  0xac   : > { %s2196_s12 = sadd.s32 4294967294, %s3241_s16   ;;  %s54_s19 = sadd.s32 1, %s3221_s29 }
  0xad   : > { %p4241_p8 = scmp.eq.s32.totalorder %s3460_s4, 0  ;;  %p61_p2 = scmp.ne.s32.totalorder %s3221_s29, %s3217_s28 }
  0xae   : > { %p67_p6 = scmp.ne.s32.totalorder %s3217_s28, %s3213_s27  ;;  %p360_p11 = scmp.eq.s32.totalorder %s2196_s12, 3 }
  0xaf   : > { %s3586_s22 = scalar_select %p4241_p8, %s3221_s29, %s54_s19  }
  0xb0   : > { %s437_s8 = sand.u32 1, %s3221_s29   ;;  %p4242_p5 = scmp.eq.s32.totalorder %s3241_s16, 0 }
  0xb1   : > { %p4243_p7 = scmp.eq.s32.totalorder %s3392_s17, 0  ;;  %p4245_p12 = scmp.eq.s32.totalorder %s3392_s17, 3 }
  0xb2   : > { %p63_p4 = por %p4242_p5, %p61_p2  ;;  %p3607_p0 = por %p360_p11, %p67_p6 }
  0xb3   : > { %p3597_p10 = por %p4243_p7, %p67_p6  ;;  %p3603_p9 = por %p4245_p12, %p61_p2 }
  0xb4   : > { %s4247_s4 = scalar_select %p3607_p0, 1, 0 }
  0xb5   : > { %s4246_s10 = scalar_select %p3603_p9, 1, 0 }
  0xb6   : > { %s2208_s18 = sshll.u32 %s437_s8, 4  ;;  %s4248_s21 = sadd.s32 %s3483_s2, %s3441_s11 }
  0xb7   : > { %s2211_s24 = sshll.u32 %s4248_s21, 6  ;;  %s4249_s0 = sld [smem:[#allocation33_spill]] }
  0xb8   : > { %s441_s1 = scalar_lea.vmem [#allocation2], %s2208_s18  ;;  %p4250_p13 = scmp.lt.s32.totalorder %s3241_s16, 4 }
  0xb9   : > { %s450_s25 = sshll.u32 %s441_s1, 4  ;;  %s3627_s19 = scalar_lea.sflag [#allocation3], %s437_s8  ;;  %s3619_s25 = int_to_ptr.vmem [resolvable:$true] %s450_s25 }
  0xba   : > { %p3623_p3 = pnand %p4250_p13, %p63_p4 }
  0xbc   : > { %p3021_p8 = pneg %p3623_p3 }
  0xbd   : > { %s3617_s5 = scalar_lea.hbm %s4249_s0, %s2211_s24  ;;  %s3024_s30 = scalar_lea.hbm %s4249_s0, 1024 }
  0xbe   : > { %s3019_s21 = scalar_lea.hbm %s3617_s5, 256  ;;  %p3025_p11 = scmp.lt.u32.totalorder %s3617_s5, %s4249_s0 }
  0xbf   : > { %p3020_p1 = scmp.ne.s32.totalorder %s3617_s5, %s3019_s21  ;;  %p3026_p5 = scmp.lt.u32.totalorder %s3024_s30, %s3019_s21 }
  0xc0   : > { %p3028_p7 = scmp.lt.u32.totalorder %s3019_s21, %s3617_s5 }
  0xc1   : > { %p3022_p2 = pnand %p3021_p8, %p3020_p1  ;;  %p3027_p4 = por %p3026_p5, %p3025_p11 }
  0xc3   : > { %p3023_p6 = pneg %p3022_p2  ;;  %p3029_p12 = por %p3028_p7, %p3027_p4 }
  0xc5   : > { %p3030_p13 = pnand %p3029_p12, %p3023_p6 }
  0xc7   : > { %3033 = shalt.err (!%p3030_p13)
}
  0xc8   : > { %s3034_s8 = scalar_lea.vmem %s3619_s25, 256  ;;  %s3249_s18 = smov [#allocation2]  }
  0xc9   : > { %p3035_p1 = scmp.ne.s32.totalorder %s3619_s25, %s3034_s8  ;;  %s3039_s24 = sshll.u32 %s3249_s18, 4  ;;  %s3040_s24 = int_to_ptr.vmem [resolvable:$false] %s3039_s24 }
  0xca   : > { %s3041_s3 = scalar_lea.vmem %s3040_s24, 512  ;;  %p3042_p9 = scmp.lt.s32.totalorder %s3619_s25, %s3040_s24 }
  0xcb   : > { %p3037_p2 = pnand %p3035_p1, %p3021_p8  ;;  %p3043_p11 = scmp.lt.s32.totalorder %s3041_s3, %s3034_s8 }
  0xcd   : > { %p3038_p0 = pneg %p3037_p2  ;;  %p3044_p5 = por %p3043_p11, %p3042_p9 }
  0xcf   : > { %p3045_p4 = pnand %p3044_p5, %p3038_p0 }
  0xd1   : > { %3048 = shalt.err (!%p3045_p4)
}
  0xd2   : > { %s4252_s21 = sld [smem:[#allocation22_spill]]  ;;  %s4253_s30 = sld [smem:[#allocation32_spill]] }
  0xd3   : > { %s4254_s1 = sld [smem:[#allocation21_spill]]  ;;  %s4255_s18 = sld [smem:[#allocation20_spill]] }
  0xd4   : > { %s4256_s8 = sld [smem:[#allocation31_spill]]  ;;  %s114_s12 = sadd.s32 4, %s3441_s11 }
  0xd5   : > { %2671 = dma.hbm_to_vmem [thread:$0]  (!%p3623_p3), %s3617_s5, 256, %s3619_s25, %s3627_s19, %s4239_s15, %s4239_s15, %s4238_s23  }
  0xd6   : > { %p115_p9 = scmp.lt.s32.totalorder %s114_s12, 7  ;;  %p4258_p7 = scmp.eq.s32.totalorder %s3241_s16, 0 }
  0xd7   : > { %p4259_p1 = scmp.eq.s32.totalorder %s3392_s17, 0  ;;  %s4261_s19 = sld [smem:[#allocation35_spill]] }
  0xd8   : > { %s126_s24 = sadd.s32 1, %s4252_s21  ;;  %p4257_p0 = scmp.lt.s32.totalorder %s4253_s30, 7 }
  0xd9   : > { %s4336_s12 = smov (!%p115_p9, %s114_s12), 7  ;;  %p133_p8 = scmp.ne.s32.totalorder %s4252_s21, %s4254_s1 }
  0xda   : > { %s4334_s30 = smov (!%p4257_p0, %s4253_s30), 7  ;;  %p139_p6 = scmp.ne.s32.totalorder %s4254_s1, %s4255_s18 }
  0xdb   : > { %s122_s3 = ssub.s32 %s4336_s12, %s4334_s30  ;;  %s486_s0 = sand.u32 1, %s4252_s21  }
  0xdc   : > { %s123_s6 = sor.u32 %s122_s3, %s4256_s8  ;;  %p135_p12 = por %p133_p8, %p4258_p7 }
  0xdd   : > { %p124_p13 = scmp.eq.s32.totalorder %s123_s6, 0  ;;  %p3673_p2 = por %p139_p6, %p4259_p1 }
  0xde   : > { %s2217_s11 = sshll.u32 %s486_s0, 2  ;;  %s497_s23 = sadd.s32 %s3483_s2, %s4336_s12 }
  0xdf   : > { %s4260_s9 = scalar_select %p3673_p2, 1, 0 }
  0xe0   : > { %s4338_s21 = smov (!%p124_p13, %s4252_s21), %s126_s24  ;;  %s2220_s15 = sshll.u32 %s497_s23, 6 }
  0xe1   : > { %s3684_s1 = scalar_lea.hbm %s4261_s19, %s2220_s15  ;;  %s488_s6 = scalar_lea.vmem [#allocation7], %s2217_s11 }
  0xe2   : > { %s501_s30 = sshll.u32 %s488_s6, 4  ;;  %p4262_p3 = scmp.lt.s32.totalorder %s3241_s16, 4  ;;  %s3686_s30 = int_to_ptr.vmem [resolvable:$true] %s501_s30 }
  0xe3   : > { %s3049_s2 = scalar_lea.hbm %s3684_s1, 64  ;;  %s3054_s12 = scalar_lea.hbm %s4261_s19, 1024 }
  0xe4   : > { %p3690_p11 = pnand %p4262_p3, %p135_p12  ;;  %p3050_p5 = scmp.ne.s32.totalorder %s3684_s1, %s3049_s2 }
  0xe5   : > { %p3055_p8 = scmp.lt.u32.totalorder %s3684_s1, %s4261_s19  ;;  %p3056_p6 = scmp.lt.u32.totalorder %s3054_s12, %s3049_s2 }
  0xe6   : > { %p3051_p4 = pneg %p3690_p11  ;;  %p3058_p12 = scmp.lt.u32.totalorder %s3049_s2, %s3684_s1 }
  0xe7   : > { %p3057_p7 = por %p3056_p6, %p3055_p8 }
  0xe8   : > { %p3052_p9 = pnand %p3051_p4, %p3050_p5 }
  0xe9   : > { %p3059_p13 = por %p3058_p12, %p3057_p7 }
  0xea   : > { %p3053_p0 = pneg %p3052_p9 }
  0xec   : > { %p3060_p1 = pnand %p3059_p13, %p3053_p0 }
  0xee   : > { %3063 = shalt.err (!%p3060_p1)
}
  0xef   : > { %s3064_s11 = scalar_lea.vmem %s3686_s30, 64  ;;  %s3250_s23 = smov [#allocation7]  }
  0xf0   : > { %p3065_p3 = scmp.ne.s32.totalorder %s3686_s30, %s3064_s11  ;;  %s3069_s15 = sshll.u32 %s3250_s23, 4  ;;  %s3070_s15 = int_to_ptr.vmem [resolvable:$false] %s3069_s15 }
  0xf1   : > { %s3071_s5 = scalar_lea.vmem %s3070_s15, 128  ;;  %p3072_p2 = scmp.lt.s32.totalorder %s3686_s30, %s3070_s15 }
  0xf2   : > { %p3067_p5 = pnand %p3065_p3, %p3051_p4  ;;  %p3073_p8 = scmp.lt.s32.totalorder %s3071_s5, %s3064_s11 }
  0xf4   : > { %p3068_p9 = pneg %p3067_p5  ;;  %p3074_p6 = por %p3073_p8, %p3072_p2 }
  0xf6   : > { %p3075_p7 = pnand %p3074_p6, %p3068_p9 }
  0xf8   : > { %3078 = shalt.err (!%p3075_p7)
}
  0xf9   : > { %2677 = dma.hbm_to_vmem [thread:$0]  (!%p3690_p11), %s3684_s1, 64, %s3686_s30, %s3510_s13  }
  0xfa   : > { %s4264_s25 = sld [smem:[#allocation28_spill]] }
 0x100   : > { %p4265_p0 = scmp.ne.s32.totalorder %s4264_s25, 0 }
 0x101   : > { %s3723_s6 = sand.u32 (!%p4265_p0), 1, %s3217_s28  }
 0x102   : > { %510 = sbr.rel (%p4265_p0) target bundleno = 1116 (0x45c), region = 68  ;;  %s2222_s2 = sshll.u32 (!%p4265_p0), %s3723_s6, 4 }
 0x103   : > { %s513_s18 = scalar_lea.sflag (!%p4265_p0), [#allocation3], %s3723_s6  ;;  %s3729_s8 = scalar_lea.vmem (!%p4265_p0), [#allocation2], %s2222_s2 }
 0x109   : > { %3164 = dma.done.wait (%p3597_p10), %s513_s18, 256  }
 0x10a   : > { %3166 = vsyncadd (%p3597_p10), %s513_s18, 4294967040  ;;  %s4266_s13 = sld [smem:[#allocation23_spill]]  ;;  %s521_s1 = sand.u32 1, %s3392_s17  }
 0x10b   : > { %s522_s12 = scalar_lea.sflag [#allocation6], %s521_s1  ;;  %p4267_p2 = scmp.ne.s32.totalorder %s4233_s14, 0 }
 0x110   : > { %s523_s30 = sand.u32 1, %s4266_s13  }
 0x111   : > { %s3737_s0 = sshll.u32 %s523_s30, 2 }
 0x112   : > { %s525_s24 = scalar_lea.vmem [#allocation5], %s3737_s0 }
 0x113   : > { %3168 = dma.done.wait (%p4267_p2), %s522_s12, 64  }
 0x114   : > { %3170 = vsyncadd (%p4267_p2), %s522_s12, 4294967232  ;;  %s4268_s3 = sld [smem:[#allocation21_spill]]  ;;  %p4269_p10 = scmp.ne.s32.totalorder %s4260_s9, 0 }
 0x11a   : > { %s532_s11 = sand.u32 1, %s4268_s3  }
 0x11b   : > { %s3745_s7 = sshll.u32 %s532_s11, 2 }
 0x11c   : > { %s534_s23 = scalar_lea.vmem [#allocation7], %s3745_s7 }
 0x11d   : > { %3172 = dma.done.wait (%p4269_p10), %s522_s12, 64  }
 0x11e   : > { %3174 = vsyncadd (%p4269_p10), %s522_s12, 4294967232  ;;  %p4270_p11 = scmp.eq.s32.totalorder %s3392_s17, 0 }
 0x120   : > { %3176 = dma.done.wait (%p4270_p11), [#allocation9], 10240   ;;  %p4271_p4 = pmov %p4270_p11 }
 0x122   : > { %3178 = vsyncadd (%p4271_p4), [#allocation9], 4294957056  ;;  %p4272_p12 = pmov %p4271_p4 }
 0x123   : > { %p4273_p13 = pmov %p4271_p4 }
 0x124   : > { %3180 = dma.done.wait (%p4272_p12), [#allocation12], 1024  }
 0x125   : > { %3182 = vsyncadd (%p4273_p13), [#allocation12], 4294966272  ;;  %v3251_v0 = vmov 0.0   ;;  %vm3252_vm0 = vmmov 0   ;;  %v2811_v1 = vld [vmem:[#allocation8] sm:$0xff]   ;;  %v2812_v2 = vld [vmem:[#allocation8 + $0x8] sm:$0xff]   ;;  %v1025_v47 = vlaneseq }
 0x126   : > { %2558 = vmatprep.subr.bf16.mxu1 %v3251_v0  ;;  %2574 = vmatprep.mubr.msk.bf16.mxu1 %vm3252_vm0, %v3251_v0  ;;  %v2813_v3 = vld [vmem:[#allocation8 + $0x10] sm:$0xff]   ;;  %v2814_v4 = vld [vmem:[#allocation8 + $0x18] sm:$0xff]   ;;  %v2815_v6 = vld [vmem:[#allocation8 + $0x20] sm:$0xff]   ;;  %s4274_s9 = sld [smem:[#allocation24_spill]]  ;;  %s4275_s5 = sld [smem:[#allocation37_spill]] }
 0x127   : > { %2538 = vmatprep.subr.bf16.mxu0 %v2811_v1  ;;  %2559 = vmatpush3.bf16.msra.mxu1 %v2811_v1  ;;  %v790_v5 = vld [vmem:[%s3729_s8] sm:$0xff]   ;;  %v2816_v7 = vld [vmem:[#allocation8 + $0x28] sm:$0xff]   ;;  %v2818_v9 = vld [vmem:[#allocation8 + $0x38] sm:$0xff]   ;;  %v3787_v48 = vshrl.u32 %v1025_v47, 7  ;;  %s4276_s1 = sld [smem:[#allocation38_spill]]  ;;  %s4297_s3 = sld [smem:[#allocation40_spill]] }
 0x128   : > { %2539 = vmatpush3.bf16.msra.mxu0 %v2811_v1  ;;  %2560 = vmatprep.subr.bf16.mxu1 %v3251_v0  ;;  %v2817_v8 = vld [vmem:[#allocation8 + $0x30] sm:$0xff]   ;;  %v792_v10 = vld [vmem:[%s3729_s8 + $0x8] sm:$0xff]   ;;  %v2821_v12 = vld [vmem:[#allocation10 + $0xc0] sm:$0xff]   ;;  %s4299_s15 = sld [smem:[#allocation43_spill]]  ;;  %s4300_s18 = sld [smem:[#allocation44_spill]] }
 0x129   : > { %2540 = vmatprep.subr.bf16.mxu0 %v2812_v2  ;;  %2554 = vmatprep.mubr.bf16.mxu0 %v790_v5  ;;  %v794_v11 = vld [vmem:[%s525_s24] sm:$0xf]  ;;  %v795_v13 = vld [vmem:[%s534_s23] sm:$0xf]  ;;  %v2822_v14 = vld [vmem:[#allocation10 + $0x80] sm:$0xff]   ;;  %v1027_v49 = vadd.s32 8, %v3787_v48 }
 0x12a   : > { %v2823_v15 = vld [vmem:[#allocation10 + $0xc8] sm:$0xff]   ;;  %v2825_v17 = vld [vmem:[#allocation10 + $0xd0] sm:$0xff]   ;;  %v2827_v19 = vld [vmem:[#allocation10 + $0xd8] sm:$0xff]   ;;  %v3796_v51 = vadd.s32 16, %v3787_v48  ;;  %v1036_v61 = vand.u32 7, %v3787_v48  ;;  %vm1116_vm1 = vcmp.lt.s32.totalorder %v3787_v48, 1 }
 0x12b   : > { %2561 = vmatpush3.bf16.msra.mxu1 %v2812_v2  ;;  %v2824_v16 = vld [vmem:[#allocation10 + $0x88] sm:$0xff]   ;;  %v2826_v18 = vld [vmem:[#allocation10 + $0x90] sm:$0xff]   ;;  %v2828_v20 = vld [vmem:[#allocation10 + $0x98] sm:$0xff]   ;;  %v1043_v56 = vand.u32 7, %v1027_v49  ;;  %vm1141_vm2 = vcmp.lt.s32.totalorder %v3787_v48, 7  ;;  %s4298_s23 = sld [smem:[#allocation41_spill]] }
 0x12c   : > { %2541 = vmatpush3.bf16.msra.mxu0 %v2812_v2  ;;  %2562 = vmatprep.subr.bf16.mxu1 %v3251_v0  ;;  %v2829_v21 = vld [vmem:[#allocation10 + $0xe0] sm:$0xff]   ;;  %v2831_v23 = vld [vmem:[#allocation10 + $0xe8] sm:$0xff]   ;;  %v2833_v25 = vld [vmem:[#allocation10 + $0xf0] sm:$0xff]   ;;  %p1015_p1 = scmp.gt.s32.totalorder %s4274_s9, 0  ;;  %v1050_v62 = vand.u32 7, %v3796_v51  ;;  %vm3836_vm5 = vcmp.lt.s32.totalorder %v1036_v61, 7 }
 0x12d   : > { %2542 = vmatprep.subr.bf16.mxu0 %v2813_v3  ;;  %v2830_v22 = vld [vmem:[#allocation10 + $0xa0] sm:$0xff]   ;;  %v2832_v24 = vld [vmem:[#allocation10 + $0xa8] sm:$0xff]   ;;  %v2834_v26 = vld [vmem:[#allocation10 + $0xb0] sm:$0xff]   ;;  %vm3821_vm3 = vcmp.ge.s32.totalorder %v1043_v56, 1  ;;  %vm3867_vm6 = vcmp.lt.s32.totalorder %v1043_v56, 7  ;;  %p1020_p3 = scmp.lt.s32.totalorder %s4274_s9, 1 }
 0x12e   : > { %v2835_v27 = vld [vmem:[#allocation10 + $0xf8] sm:$0xff]   ;;  %v2837_v29 = vld [vmem:[#allocation10 + $0x40] sm:$0xff]   ;;  %v2841_v32 = vld [vmem:[#allocation10 + $0x48] sm:$0xff]   ;;  %s1016_s14 = scalar_select %p1015_p1, 1, 0  ;;  %vm3830_vm4 = vcmp.ge.s32.totalorder %v1050_v62, 1 }
 0x12f   : > { %2563 = vmatpush3.bf16.msra.mxu1 %v2813_v3  ;;  %v2836_v28 = vld [vmem:[#allocation10 + $0xb8] sm:$0xff]   ;;  %v2838_v30 = vld [vmem:[#allocation10] sm:$0xff]   ;;  %v2842_v33 = vld [vmem:[#allocation10 + $0x8] sm:$0xff]   ;;  %vm3944_vm12 = vcmp.lt.s32.totalorder %v1050_v62, 7  ;;  %s1021_s30 = scalar_select %p1020_p3, 1, 0 }
 0x130   : > { %2543 = vmatpush3.bf16.msra.mxu0 %v2813_v3  ;;  %2564 = vmatprep.subr.bf16.mxu1 %v3251_v0  ;;  %v2839_v31 = vld [vmem:[#allocation10 + $0x1c0] sm:$0xff]   ;;  %v2845_v34 = vld [vmem:[#allocation10 + $0x50] sm:$0xff]   ;;  %v2849_v36 = vld [vmem:[#allocation10 + $0x58] sm:$0xff]   ;;  %s1017_s25 = scvt.s32.f32 %s1016_s14  ;;  %vm3968_vm15 = vcmp.ge.s32.totalorder %v1036_v61, 1  ;;  %s4301_s13 = sld [smem:[#allocation25_spill]] }
 0x131   : > { %2544 = vmatprep.subr.bf16.mxu0 %v2814_v4  ;;  %v2846_v35 = vld [vmem:[#allocation10 + $0x10] sm:$0xff]   ;;  %v2850_v37 = vld [vmem:[#allocation10 + $0x18] sm:$0xff]   ;;  %v2853_v38 = vld [vmem:[#allocation10 + $0x60] sm:$0xff]   ;;  %s1022_s0 = scvt.s32.f32 %s1021_s30  ;;  %s4302_s11 = sld [smem:[#allocation45_spill]] }
 0x132   : > { %v2854_v39 = vld [vmem:[#allocation10 + $0x20] sm:$0xff]   ;;  %v2857_v40 = vld [vmem:[#allocation10 + $0x68] sm:$0xff]   ;;  %v2861_v42 = vld [vmem:[#allocation10 + $0x70] sm:$0xff]   ;;  %v1018_v58 = vstv %s1017_s25  ;;  %p4303_p9 = scmp.ne.s32.totalorder %s4246_s10, 0  ;;  %s3253_s14 = smov [#allocation13]  }
 0x133   : > { %2565 = vmatpush3.bf16.msra.mxu1 %v2814_v4  ;;  %v2858_v41 = vld [vmem:[#allocation10 + $0x28] sm:$0xff]   ;;  %v2862_v43 = vld [vmem:[#allocation10 + $0x30] sm:$0xff]   ;;  %v2865_v44 = vld [vmem:[#allocation10 + $0x78] sm:$0xff]   ;;  %s3083_s17 = sshll.u32 %s3253_s14, 4  ;;  %s3084_s17 = int_to_ptr.vmem [resolvable:$false] %s3083_s17 }
 0x134   : > { %2545 = vmatpush3.bf16.msra.mxu0 %v2814_v4  ;;  %2566 = vmatprep.subr.bf16.mxu1 %v3251_v0  ;;  %v2866_v45 = vld [vmem:[#allocation10 + $0x38] sm:$0xff]   ;;  %v2869_v46 = vld [vmem:[#allocation10 + $0x140] sm:$0xff]   ;;  %v3793_v50 = vld [vmem:[%s4275_s5] ss:$0 sm:$0xff] }
 0x135   : > { %2546 = vmatprep.subr.bf16.mxu0 %v2815_v6  ;;  %v3801_v52 = vld [vmem:[%s4276_s1] ss:$0 sm:$0xff]  ;;  %vm2319_vm9 = vmpackc.low %vm3830_vm4, %vm3821_vm3  ;;  %v2852_v51 = vld [vmem:[#allocation10 + $0x198] sm:$0xff]   ;;  %s2362_s1 = sshll.u32 %s4274_s9, 2  ;;  %s596_s9 = scalar_lea.vmem [#allocation13], %s2222_s2 }
 0x136   : > { %vm2322_vm10 = vmpackc.low %vm3867_vm6, %vm3836_vm5  ;;  %v2855_v62 = vld [vmem:[#allocation10 + $0x1e0] sm:$0xff]   ;;  %s2363_s30 = sshll.u32 %s4301_s13, 3  ;;  %s2029_s12 = sshll.u32 %s596_s9, 4  ;;  %s4083_s12 = int_to_ptr.vmem [resolvable:$true] %s2029_s12 }
 0x137   : > { %2567 = vmatpush3.bf16.msra.mxu1 %v2815_v6  ;;  %s2014_s2 = scalar_lea.sflag [#allocation4], %s3723_s6  ;;  %p3086_p7 = scmp.lt.s32.totalorder %s4083_s12, %s3084_s17 }
 0x138   : > { %2547 = vmatpush3.bf16.msra.mxu0 %v2815_v6  ;;  %2568 = vmatprep.subr.bf16.mxu1 %v3251_v0 }
 0x139   : > { %2548 = vmatprep.subr.bf16.mxu0 %v2816_v7 }
 0x13b   : > { %2569 = vmatpush3.bf16.msra.mxu1 %v2816_v7 }
 0x13c   : > { %2549 = vmatpush3.bf16.msra.mxu0 %v2816_v7  ;;  %2570 = vmatprep.subr.bf16.mxu1 %v3251_v0 }
 0x13d   : > { %2550 = vmatprep.subr.bf16.mxu0 %v2817_v8 }
 0x13f   : > { %2571 = vmatpush3.bf16.msra.mxu1 %v2817_v8 }
 0x140   : > { %2551 = vmatpush3.bf16.msra.mxu0 %v2817_v8  ;;  %2572 = vmatprep.subr.bf16.mxu1 %v3251_v0 }
 0x141   : > { %2552 = vmatprep.subr.bf16.mxu0 %v2818_v9 }
 0x143   : > { %2573 = vmatpush3.bf16.msra.mxu1 %v2818_v9 }
 0x144   : > { %2553 = vmatpush3.bf16.msra.mxu0 %v2818_v9  ;;  %2406 = vmatprep.subr.bf16.mxu1 %v2837_v29 }
 0x145   : > { %2578 = vmatprep.subr.bf16.mxu0 %v3251_v0 }
 0x146   : > { %2575 = vmatmul.mubr.bf16.vlgmr.msra.gmra.mrb[0].mxu1 %v794_v11 }
 0x147   : > { %2555 = vmatmul.mubr.bf16.vlgmr.msra.gmra.mrb[0].mxu0 %v792_v10  ;;  %2407 = vmatpush3.bf16.msra.mxu1 %v2838_v30 }
 0x148   : > { %2579 = vmatpush3.bf16.msra.mxu0 %v2811_v1  ;;  %2594 = vmatprep.mubr.msk.bf16.mxu0 %vm3252_vm0, %v3251_v0  ;;  %vm2313_vm0 = vmpackc.low %vm3821_vm3, %vm3968_vm15 }
 0x149   : > { %2580 = vmatprep.subr.bf16.mxu0 %v3251_v0  ;;  %2408 = vmatprep.subr.bf16.mxu1 %v2841_v32  ;;  %vm2331_vm3 = vmpackc.low %vm3944_vm12, %vm3867_vm6 }
 0x14b   : > { %2409 = vmatpush3.bf16.msra.mxu1 %v2842_v33 }
 0x14c   : > { %2581 = vmatpush3.bf16.msra.mxu0 %v2812_v2  ;;  %2410 = vmatprep.subr.bf16.mxu1 %v2845_v34  ;;  %v2876_v34 = vld [vmem:[#allocation10 + $0x118] sm:$0xff]  }
 0x14d   : > { %2582 = vmatprep.subr.bf16.mxu0 %v3251_v0 }
 0x14f   : > { %2411 = vmatpush3.bf16.msra.mxu1 %v2846_v35 }
 0x150   : > { %2583 = vmatpush3.bf16.msra.mxu0 %v2813_v3  ;;  %2412 = vmatprep.subr.bf16.mxu1 %v2849_v36  ;;  %v3811_v3 = vadd.s32 24, %v3787_v48 }
 0x151   : > { %2584 = vmatprep.subr.bf16.mxu0 %v3251_v0 }
 0x153   : > { %2413 = vmatpush3.bf16.msra.mxu1 %v2850_v37 }
 0x154   : > { %2585 = vmatpush3.bf16.msra.mxu0 %v2814_v4  ;;  %2414 = vmatprep.subr.bf16.mxu1 %v2853_v38 }
 0x155   : > { %2586 = vmatprep.subr.bf16.mxu0 %v3251_v0 }
 0x157   : > { %2415 = vmatpush3.bf16.msra.mxu1 %v2854_v39 }
 0x158   : > { %2587 = vmatpush3.bf16.msra.mxu0 %v2815_v6  ;;  %2416 = vmatprep.subr.bf16.mxu1 %v2857_v40 }
 0x159   : > { %2588 = vmatprep.subr.bf16.mxu0 %v3251_v0 }
 0x15b   : > { %2417 = vmatpush3.bf16.msra.mxu1 %v2858_v41  ;;  %v2879_v41 = vld [vmem:[#allocation10 + $0x168] sm:$0xff]  }
 0x15c   : > { %2589 = vmatpush3.bf16.msra.mxu0 %v2816_v7  ;;  %2418 = vmatprep.subr.bf16.mxu1 %v2861_v42  ;;  %v2882_v42 = vld [vmem:[#allocation10 + $0x130] sm:$0xff]  }
 0x15d   : > { %2590 = vmatprep.subr.bf16.mxu0 %v3251_v0 }
 0x15f   : > { %2419 = vmatpush3.bf16.msra.mxu1 %v2862_v43 }
 0x160   : > { %2591 = vmatpush3.bf16.msra.mxu0 %v2817_v8  ;;  %2420 = vmatprep.subr.bf16.mxu1 %v2865_v44  ;;  %v3817_v8 = vadd.s32 32, %v3787_v48 }
 0x161   : > { %2592 = vmatprep.subr.bf16.mxu0 %v3251_v0 }
 0x163   : > { %2421 = vmatpush3.bf16.msra.mxu1 %v2866_v45 }
 0x164   : > { %2593 = vmatpush3.bf16.msra.mxu0 %v2818_v9  ;;  %2462 = vmatprep.subr.bf16.mxu1 %v2869_v46 }
 0x165   : > { %2434 = vmatprep.subr.bf16.mxu0 %v2821_v12 }
 0x167   : > { %2595 = vmatmul.mubr.bf16.vlgmr.msra.gmra.mrb[4].mxu0 %v795_v13 }
 0x168   : > { %2435 = vmatpush3.bf16.msra.mxu0 %v2822_v14 }
 0x169   : > { %2436 = vmatprep.subr.bf16.mxu0 %v2823_v15  ;;  %v2880_v15 = vld [vmem:[#allocation10 + $0x128] sm:$0xff]  }
 0x16c   : > { %2437 = vmatpush3.bf16.msra.mxu0 %v2824_v16 }
 0x16d   : > { %2438 = vmatprep.subr.bf16.mxu0 %v2825_v17 }
 0x170   : > { %2439 = vmatpush3.bf16.msra.mxu0 %v2826_v18 }
 0x171   : > { %2440 = vmatprep.subr.bf16.mxu0 %v2827_v19 }
 0x174   : > { %2441 = vmatpush3.bf16.msra.mxu0 %v2828_v20  ;;  %v1057_v20 = vand.u32 7, %v3811_v3  ;;  %v2848_v3 = vld [vmem:[#allocation10 + $0x190] sm:$0xff]  }
 0x175   : > { %2442 = vmatprep.subr.bf16.mxu0 %v2829_v21 }
 0x176   : > { %vm3887_vm7 = vcmp.ge.s32.totalorder %v1057_v20, 1  ;;  %vm3948_vm13 = vcmp.lt.s32.totalorder %v1057_v20, 7  ;;  %v2863_v20 = vld [vmem:[#allocation10 + $0x1f0] sm:$0xff]  }
 0x177   : > { %vm2328_vm14 = vmpackc.low %vm3948_vm13, %vm3944_vm12 }
 0x178   : > { %2443 = vmatpush3.bf16.msra.mxu0 %v2830_v22 }
 0x179   : > { %2444 = vmatprep.subr.bf16.mxu0 %v2831_v23 }
 0x17c   : > { %2445 = vmatpush3.bf16.msra.mxu0 %v2832_v24  ;;  %v1064_v24 = vand.u32 7, %v3817_v8  ;;  %v2887_v8 = vld [vmem:[#allocation10 + $0x210] sm:$0xff]  }
 0x17d   : > { %2446 = vmatprep.subr.bf16.mxu0 %v2833_v25 }
 0x17e   : > { %vm3893_vm8 = vcmp.ge.s32.totalorder %v1064_v24, 1 }
 0x17f   : > { %vm2325_vm11 = vmpackc.low %vm3893_vm8, %vm3887_vm7 }
 0x180   : > { %2447 = vmatpush3.bf16.msra.mxu0 %v2834_v26 }
 0x181   : > { %2448 = vmatprep.subr.bf16.mxu0 %v2835_v27 }
 0x184   : > { %2449 = vmatpush3.bf16.msra.mxu0 %v2836_v28 }
 0x185   : > { %2490 = vmatprep.subr.bf16.mxu0 %v2839_v31 }
 0x219   : > { %v963_v53 = vpop.f32.mrb[0].mxu1 }
 0x21a   : > { %v969_v54 = vmul.f32 %v3793_v50, %v963_v53  ;;  %v2556_v55 = vpop.f32.mrb[0].mxu0  ;;  %v2576_v57 = vpop.f32.mrb[1].mxu1 }
 0x21b   : > { %v913_v59 = vmul.f32 %v2556_v55, %v3793_v50  ;;  %v890_v60 = vpop.f32.mrb[1].mxu0  ;;  %v966_v63 = vpop.f32.mrb[2].mxu1  ;;  %v2840_v55 = vld [vmem:[#allocation10 + $0x180] sm:$0xff]  }
 0x21c   : > { %v970_v0 = vadd.f32 %v3801_v52, %v969_v54  ;;  %v911_v1 = vmul.f32 %v3793_v50, %v890_v60  ;;  %v2557_v2 = vpop.f32.mrb[2].mxu0  ;;  %v2577_v4 = vpop.f32.mrb[3].mxu1  ;;  %v2844_v63 = vld [vmem:[#allocation10 + $0x188] sm:$0xff]  }
 0x21d   : > { %v923_v5 = vadd.f32 %v3801_v52, %v913_v59  ;;  %v914_v6 = vmul.f32 %v2557_v2, %v3793_v50  ;;  %v893_v7 = vpop.f32.mrb[3].mxu0  ;;  %v2851_v4 = vld [vmem:[#allocation10 + $0x1d8] sm:$0xff]   ;;  %v2898_v2 = vld [vmem:[#allocation11 + $0x28] sm:$0xff]  }
 0x21e   : > { %v971_v9 = vmax.f32 %v970_v0, 0.0  ;;  %v921_v10 = vadd.f32 %v3801_v52, %v911_v1  ;;  %v912_v11 = vmul.f32 %v3793_v50, %v893_v7  ;;  %v2847_v0 = vld [vmem:[#allocation10 + $0x1d0] sm:$0xff]   ;;  %v2897_v1 = vld [vmem:[#allocation11 + $0x20] sm:$0xff]  }
 0x21f   : > { %v3825_v13 = vmax.f32 %v923_v5, 0.0  ;;  %v924_v14 = vadd.f32 %v3801_v52, %v914_v6  ;;  %v2856_v5 = vld [vmem:[#allocation10 + $0x1a0] sm:$0xff]   ;;  %v2859_v6 = vld [vmem:[#allocation10 + $0x1e8] sm:$0xff]  }
 0x220   : > { %v3840_v17 = vmul.f32 %v1018_v58, %v971_v9  ;;  %v3842_v18 = vmax.f32 %v921_v10, 0.0  ;;  %v922_v19 = vadd.f32 %v3801_v52, %v912_v11  ;;  %v2843_v58 = vld [vmem:[#allocation10 + $0x1c8] sm:$0xff]  }
 0x221   : > { %v1113_v21 = vrot.slane %v3825_v13, 7  ;;  %v1138_v22 = vrot.slane %v3825_v13, 1  ;;  %v3848_v23 = vmax.f32 %v924_v14, 0.0  ;;  %v2860_v14 = vld [vmem:[#allocation10 + $0x1a8] sm:$0xff]  }
 0x222   : > { %v1110_v25 = vrot.slane %v3840_v17, 7  ;;  %v1135_v26 = vrot.slane %v3840_v17, 1  ;;  %v1111_v27 = vrot.slane %v3842_v18, 7  ;;  %v1136_v28 = vrot.slane %v3842_v18, 1 }
 0x223   : > { %v1114_v29 = vrot.slane %v3848_v23, 7  ;;  %v1139_v30 = vrot.slane %v3848_v23, 1  ;;  %v3857_v31 = vmax.f32 %v922_v19, 0.0  ;;  %v1155_v32 = vpack.c.bf16 %v3842_v18, %v3840_v17 }
 0x224   : > { %v3865_v33 = vsel %vm1116_vm1, %v1110_v25, %v1111_v27  ;;  %v1146_v35 = vsel %vm1141_vm2, %v1135_v26, %v1136_v28  ;;  %v1164_v36 = vpack.c.bf16 %v3848_v23, %v3825_v13 }
 0x225   : > { %v1112_v37 = vrot.slane %v3857_v31, 7  ;;  %v1137_v38 = vrot.slane %v3857_v31, 1  ;;  %v1158_v39 = vpack.c.bf16 %v3857_v31, %v3842_v18  ;;  %1633 = vmatprep.mubr.bf16.mxu1 %v1155_v32  ;;  %v3885_v40 = vsel %vm1116_vm1, %v1113_v21, %v1114_v29  ;;  %v2867_v32 = vld [vmem:[#allocation10 + $0x1f8] sm:$0xff]   ;;  %v2889_v18 = vld [vmem:[#allocation10 + $0x220] sm:$0xff]  }
 0x226   : > { %v3901_v43 = vsel %vm1141_vm2, %v1138_v22, %v1139_v30  ;;  %v3905_v44 = vpack.c.bf16 %v3825_v13, %v3857_v31  ;;  %v2890_v31 = vld [vmem:[#allocation10 + $0x228] sm:$0xff]   ;;  %v2892_v13 = vld [vmem:[#allocation10 + $0x238] sm:$0xff]  }
 0x227   : > { %v1120_v45 = vsel %vm1116_vm1, %v1111_v27, %v1112_v37  ;;  %v3915_v46 = vsel %vm1141_vm2, %v1136_v28, %v1137_v38  ;;  %v1119_v47 = vsel %vm1116_vm1, %v1112_v37, %v1113_v21  ;;  %v3921_v49 = vsel %vm1141_vm2, %v1137_v38, %v1138_v22  ;;  %v2864_v27 = vld [vmem:[#allocation10 + $0x1b0] sm:$0xff]   ;;  %v2868_v38 = vld [vmem:[#allocation10 + $0x1b8] sm:$0xff]  }
 0x228   : > { %v2320_v53 = vpack.c.bf16 %v1120_v45, %v3865_v33  ;;  %v2323_v54 = vpack.c.bf16 %v3915_v46, %v1146_v35  ;;  %v3929_v56 = vpack.c.bf16 %v1119_v47, %v1120_v45  ;;  %v2326_v57 = vpack.c.bf16 %v3885_v40, %v1119_v47  ;;  %v2870_v47 = vld [vmem:[#allocation10 + $0x100] sm:$0xff]  }
 0x229   : > { %v3938_v59 = vpack.c.bf16 %v3901_v43, %v3921_v49  ;;  %v2332_v60 = vpack.c.bf16 %v3921_v49, %v3915_v46  ;;  %v1023_v21 = vstv %s1022_s0  ;;  %v3974_v45 = vadd.s32 40, %v3787_v48  ;;  %v2872_v48 = vld [vmem:[#allocation10 + $0x108] sm:$0xff]   ;;  %v2885_v46 = vld [vmem:[#allocation10 + $0x200] sm:$0xff]   ;;  %s2026_s0 = sadd.s32 %s2363_s30, %s2362_s1 }
 0x22a   : > { %2321 = vmatprep.mubr.msk.bf16.mxu0 %vm2319_vm9, %v2320_v53 }
 0x22b   : > { %2324 = vmatmul.mubr.msk.bf16.vlgmr.msra.gmra.mrb[8].mxu0 %vm2322_vm10, %v2323_v54  ;;  %v1071_v17 = vand.u32 7, %v3974_v45 }
 0x22c   : > { %2491 = vmatpush3.bf16.msra.mxu0 %v2840_v55  ;;  %2327 = vmatprep.mubr.msk.bf16.mxu0 %vm2325_vm11, %v2326_v57  ;;  %v2871_v55 = vld [vmem:[#allocation10 + $0x148] sm:$0xff]  }
 0x22d   : > { %2492 = vmatprep.subr.bf16.mxu0 %v2843_v58 }
 0x230   : > { %2493 = vmatpush3.bf16.msra.mxu0 %v2844_v63  ;;  %v2884_v63 = vld [vmem:[#allocation10 + $0x138] sm:$0xff]  }
 0x231   : > { %2494 = vmatprep.subr.bf16.mxu0 %v2847_v0  ;;  %v2896_v0 = vld [vmem:[#allocation11 + $0x18] sm:$0xff]  }
 0x233   : > { %2330 = vmatmul.mubr.msk.bf16.gmra.mrb[12].mxu0 %vm2328_vm14, %v3938_v59 }
 0x234   : > { %2495 = vmatpush3.bf16.msra.mxu0 %v2848_v3  ;;  %1780 = vmatprep.mubr.bf16.mxu0 %v3905_v44  ;;  %v2899_v3 = vld [vmem:[#allocation11 + $0x30] sm:$0xff]  }
 0x235   : > { %2496 = vmatprep.subr.bf16.mxu0 %v2851_v4  ;;  %v2900_v4 = vld [vmem:[#allocation11 + $0x38] sm:$0xff]  }
 0x238   : > { %2497 = vmatpush3.bf16.msra.mxu0 %v2852_v51 }
 0x239   : > { %2498 = vmatprep.subr.bf16.mxu0 %v2855_v62 }
 0x23a   : > { %v1006_v7 = vpop.f32.mrb[4].mxu0 }
 0x23b   : > { %v1012_v9 = vmul.f32 %v3793_v50, %v1006_v7  ;;  %v2596_v10 = vpop.f32.mrb[5].mxu0 }
 0x23c   : > { %2499 = vmatpush3.bf16.msra.mxu0 %v2856_v5  ;;  %v1009_v11 = vpop.f32.mrb[6].mxu0 }
 0x23d   : > { %v1013_v16 = vadd.f32 %v3801_v52, %v1012_v9  ;;  %v2597_v19 = vpop.f32.mrb[7].mxu0  ;;  %2500 = vmatprep.subr.bf16.mxu0 %v2859_v6 }
 0x23f   : > { %v1014_v22 = vmax.f32 %v1013_v16, 0.0 }
 0x240   : > { %2501 = vmatpush3.bf16.msra.mxu0 %v2860_v14 }
 0x241   : > { %v1024_v28 = vmul.f32 %v1023_v21, %v1014_v22  ;;  %2502 = vmatprep.subr.bf16.mxu0 %v2863_v20 }
 0x243   : > { %v1115_v35 = vrot.slane %v1024_v28, 7  ;;  %v1140_v37 = vrot.slane %v1024_v28, 1  ;;  %v1167_v52 = vpack.c.bf16 %v1024_v28, %v3848_v23  ;;  %v2893_v23 = vld [vmem:[#allocation11] sm:$0xff]  }
 0x244   : > { %2503 = vmatpush3.bf16.msra.mxu0 %v2864_v27 }
 0x245   : > { %2504 = vmatprep.subr.bf16.mxu0 %v2867_v32  ;;  %v1122_v61 = vsel %vm1116_vm1, %v1115_v35, %v1110_v25  ;;  %v1117_v53 = vsel %vm1116_vm1, %v1114_v29, %v1115_v35  ;;  %v3992_v54 = vsel %vm1141_vm2, %v1139_v30, %v1140_v37  ;;  %v3998_v12 = vsel %vm1141_vm2, %v1140_v37, %v1135_v26  ;;  %vm2316_vm1 = vmpackc.low %vm3887_vm7, %vm3830_vm4  ;;  %v2873_v26 = vld [vmem:[#allocation10 + $0x150] sm:$0xff]  }
 0x246   : > { %v2314_v25 = vpack.c.bf16 %v3865_v33, %v1122_v61  ;;  %v2341_v57 = vpack.c.bf16 %v1117_v53, %v3885_v40  ;;  %v2335_v29 = vpack.c.bf16 %v3992_v54, %v3901_v43  ;;  %v2347_v58 = vpack.c.bf16 %v3998_v12, %v3992_v54  ;;  %v2874_v30 = vld [vmem:[#allocation10 + $0x110] sm:$0xff]   ;;  %v2875_v33 = vld [vmem:[#allocation10 + $0x158] sm:$0xff]   ;;  %v2877_v40 = vld [vmem:[#allocation10 + $0x160] sm:$0xff]  }
 0x247   : > { %vm1109_vm2 = vcmp.ge.s32.totalorder %v1071_v17, 1  ;;  %v2878_v43 = vld [vmem:[#allocation10 + $0x120] sm:$0xff]   ;;  %vm4035_vm4 = vcmp.lt.s32.totalorder %v1064_v24, 7  ;;  %v2888_v24 = vld [vmem:[#allocation10 + $0x218] sm:$0xff]   ;;  %vm1134_vm7 = vcmp.lt.s32.totalorder %v1071_v17, 7 }
 0x248   : > { %2505 = vmatpush3.bf16.msra.mxu0 %v2868_v38  ;;  %2315 = vmatmul.mubr.msk.bf16.vlgmr.msra.gmra.mrb[4].mxu1 %vm2313_vm0, %v2314_v25  ;;  %vm2340_vm5 = vmpackc.low %vm1109_vm2, %vm3893_vm8 }
 0x249   : > { %2463 = vmatpush3.bf16.msra.mxu1 %v2870_v47  ;;  %1641 = vmatprep.mubr.bf16.mxu1 %v3905_v44  ;;  %v2881_v44 = vld [vmem:[#allocation10 + $0x170] sm:$0xff]   ;;  %vm2334_vm6 = vmpackc.low %vm4035_vm4, %vm3948_vm13 }
 0x24a   : > { %2464 = vmatprep.subr.bf16.mxu1 %v2871_v55  ;;  %vm2346_vm8 = vmpackc.low %vm1134_vm7, %vm4035_vm4  ;;  %2618 = vmatprep.subr.bf16.mxu0 %v2893_v23 }
 0x24b   : > { %2339 = vmatmul.mubr.msk.bf16.vlgmr.msra.gmra.mrb[16].mxu0 %vm2316_vm1, %v3929_v56 }
 0x24c   : > { %1788 = vmatprep.mubr.bf16.mxu0 %v1167_v52  ;;  %2619 = vmatpush3.bf16.msra.mxu0 %v2893_v23 }
 0x24d   : > { %2465 = vmatpush3.bf16.msra.mxu1 %v2872_v48 }
 0x24e   : > { %2466 = vmatprep.subr.bf16.mxu1 %v2873_v26 }
 0x250   : > { %2318 = vmatmul.mubr.msk.bf16.gmra.mrb[8].mxu1 %vm2316_vm1, %v3929_v56  ;;  %v2883_v56 = vld [vmem:[#allocation10 + $0x178] sm:$0xff]  }
 0x251   : > { %2467 = vmatpush3.bf16.msra.mxu1 %v2874_v30  ;;  %2333 = vmatprep.mubr.msk.bf16.mxu1 %vm2331_vm3, %v2332_v60  ;;  %v2886_v60 = vld [vmem:[#allocation10 + $0x208] sm:$0xff]  }
 0x252   : > { %2468 = vmatprep.subr.bf16.mxu1 %v2875_v33 }
 0x253   : > { %2342 = vmatmul.mubr.msk.bf16.gmra.mrb[20].mxu0 %vm2340_vm5, %v2341_v57 }
 0x255   : > { %2469 = vmatpush3.bf16.msra.mxu1 %v2876_v34 }
 0x256   : > { %2470 = vmatprep.subr.bf16.mxu1 %v2877_v40 }
 0x259   : > { %2471 = vmatpush3.bf16.msra.mxu1 %v2878_v43 }
 0x25a   : > { %2472 = vmatprep.subr.bf16.mxu1 %v2879_v41 }
 0x25d   : > { %2473 = vmatpush3.bf16.msra.mxu1 %v2880_v15 }
 0x25e   : > { %2474 = vmatprep.subr.bf16.mxu1 %v2881_v44 }
 0x261   : > { %2475 = vmatpush3.bf16.msra.mxu1 %v2882_v42 }
 0x262   : > { %2476 = vmatprep.subr.bf16.mxu1 %v2883_v56 }
 0x265   : > { %2477 = vmatpush3.bf16.msra.mxu1 %v2884_v63 }
 0x266   : > { %2598 = vmatprep.subr.bf16.mxu1 %v2885_v46 }
 0x268   : > { %1732 = vmatmul.mubr.bf16.vlgmr.msra.gmra.mrb[12].mxu1 %v1158_v39  ;;  %v2891_v39 = vld [vmem:[#allocation10 + $0x230] sm:$0xff]  }
 0x269   : > { %2336 = vmatprep.mubr.msk.bf16.mxu1 %vm2334_vm6, %v2335_v29  ;;  %2599 = vmatpush3.bf16.msra.mxu1 %v2885_v46 }
 0x26a   : > { %2600 = vmatprep.subr.bf16.mxu1 %v2886_v60 }
 0x26d   : > { %2601 = vmatpush3.bf16.msra.mxu1 %v2886_v60 }
 0x26e   : > { %2602 = vmatprep.subr.bf16.mxu1 %v2887_v8 }
 0x270   : > { %1740 = vmatmul.mubr.bf16.gmra.mrb[16].mxu1 %v1164_v36  ;;  %v2894_v36 = vld [vmem:[#allocation11 + $0x8] sm:$0xff]  }
 0x271   : > { %2603 = vmatpush3.bf16.msra.mxu1 %v2887_v8  ;;  %2614 = vmatprep.mubr.msk.bf16.mxu1 %vm2328_vm14, %v3938_v59  ;;  %v2895_v59 = vld [vmem:[#allocation11 + $0x10] sm:$0xff]  }
 0x272   : > { %2604 = vmatprep.subr.bf16.mxu1 %v2888_v24  ;;  %2620 = vmatprep.subr.bf16.mxu0 %v2894_v36 }
 0x273   : > { %2621 = vmatpush3.bf16.msra.mxu0 %v2894_v36 }
 0x274   : > { %2622 = vmatprep.subr.bf16.mxu0 %v2895_v59 }
 0x275   : > { %2605 = vmatpush3.bf16.msra.mxu1 %v2888_v24 }
 0x276   : > { %2606 = vmatprep.subr.bf16.mxu1 %v2889_v18 }
 0x277   : > { %2623 = vmatpush3.bf16.msra.mxu0 %v2895_v59 }
 0x278   : > { %2624 = vmatprep.subr.bf16.mxu0 %v2896_v0 }
 0x279   : > { %2607 = vmatpush3.bf16.msra.mxu1 %v2889_v18 }
 0x27a   : > { %2608 = vmatprep.subr.bf16.mxu1 %v2890_v31 }
 0x27b   : > { %2625 = vmatpush3.bf16.msra.mxu0 %v2896_v0 }
 0x27c   : > { %2626 = vmatprep.subr.bf16.mxu0 %v2897_v1 }
 0x27d   : > { %2609 = vmatpush3.bf16.msra.mxu1 %v2890_v31 }
 0x27e   : > { %2610 = vmatprep.subr.bf16.mxu1 %v2891_v39 }
 0x27f   : > { %2627 = vmatpush3.bf16.msra.mxu0 %v2897_v1  ;;  %v2349_v1 = vld [vmem:[%s4297_s3] ss:$0 sm:$0xff] }
 0x280   : > { %2628 = vmatprep.subr.bf16.mxu0 %v2898_v2 }
 0x281   : > { %2611 = vmatpush3.bf16.msra.mxu1 %v2891_v39 }
 0x282   : > { %2612 = vmatprep.subr.bf16.mxu1 %v2892_v13 }
 0x283   : > { %2629 = vmatpush3.bf16.msra.mxu0 %v2898_v2 }
 0x284   : > { %2630 = vmatprep.subr.bf16.mxu0 %v2899_v3 }
 0x285   : > { %2613 = vmatpush3.bf16.msra.mxu1 %v2892_v13 }
 0x287   : > { %2631 = vmatpush3.bf16.msra.mxu0 %v2899_v3 }
 0x288   : > { %2615 = vmatmul.mubr.msk.bf16.vlgmr.msra.gmra.mrb[20].mxu1 %vm2346_vm8, %v2347_v58  ;;  %2632 = vmatprep.subr.bf16.mxu0 %v2900_v4 }
 0x28b   : > { %2633 = vmatpush3.bf16.msra.mxu0 %v2900_v4 }
 0x2fe   : > { %v2450_v51 = vpop.f32.mrb[8].mxu0 }
 0x2ff   : > { %v2451_v62 = vpop.f32.mrb[9].mxu0 }
 0x300   : > { %v2452_v5 = vadd.f32 %v2451_v62, %v2450_v51  ;;  %v2453_v6 = vpop.f32.mrb[10].mxu0  ;;  %v2350_v51 = vld [vmem:[%s4298_s23] ss:$0 sm:$0xff]  ;;  %s3079_s23 = scalar_lea.vmem %s4083_s12, 256 }
 0x301   : > { %v2454_v7 = vpop.f32.mrb[11].mxu0  ;;  %p3080_p5 = scmp.ne.s32.totalorder %s4083_s12, %s3079_s23 }
 0x302   : > { %v2455_v9 = vadd.f32 %v2454_v7, %v2453_v6 }
 0x303   : > { %p3081_p8 = pnand %p3080_p5, %p4303_p9 }
 0x305   : > { %p3082_p6 = pneg %p3081_p8 }
 0x306   : > { %v2456_v10 = vpop.f32.mrb[12].mxu0 }
 0x307   : > { %v2457_v11 = vpop.f32.mrb[13].mxu0 }
 0x308   : > { %v2458_v14 = vadd.f32 %v2457_v11, %v2456_v10  ;;  %v2459_v16 = vpop.f32.mrb[14].mxu0 }
 0x309   : > { %v2460_v19 = vpop.f32.mrb[15].mxu0 }
 0x30a   : > { %v2461_v20 = vadd.f32 %v2460_v19, %v2459_v16 }
 0x31b   : > { %v2422_v21 = vpop.f32.mrb[4].mxu1 }
 0x31c   : > { %v2423_v22 = vpop.f32.mrb[5].mxu1 }
 0x31d   : > { %v2424_v27 = vadd.f32 %v2423_v22, %v2422_v21  ;;  %v2425_v28 = vpop.f32.mrb[6].mxu1 }
 0x31e   : > { %v2506_v32 = vpop.f32.mrb[16].mxu0  ;;  %v2426_v50 = vpop.f32.mrb[7].mxu1 }
 0x31f   : > { %v1685_v35 = vadd.f32 %v2452_v5, %v2424_v27  ;;  %v2507_v37 = vpop.f32.mrb[17].mxu0  ;;  %v2427_v52 = vadd.f32 %v2426_v50, %v2425_v28 }
 0x320   : > { %v2508_v38 = vadd.f32 %v2507_v37, %v2506_v32  ;;  %v2509_v45 = vpop.f32.mrb[18].mxu0 }
 0x321   : > { %v1688_v61 = vadd.f32 %v2455_v9, %v2427_v52  ;;  %v2510_v47 = vpop.f32.mrb[19].mxu0  ;;  %v2359_v52 = vld [vmem:[%s4299_s15] ss:$0 sm:$0xff]  ;;  %s3085_s15 = scalar_lea.vmem %s3084_s17, 512 }
 0x322   : > { %v2511_v53 = vadd.f32 %v2510_v47, %v2509_v45  ;;  %p3087_p0 = scmp.lt.s32.totalorder %s3085_s15, %s3079_s23 }
 0x323   : > { %v2428_v54 = vpop.f32.mrb[8].mxu1 }
 0x324   : > { %v2429_v12 = vpop.f32.mrb[9].mxu1  ;;  %p3088_p2 = por %p3087_p0, %p3086_p7 }
 0x325   : > { %v2430_v25 = vadd.f32 %v2429_v12, %v2428_v54  ;;  %v2431_v55 = vpop.f32.mrb[10].mxu1  ;;  %v2903_v12 = vld [vmem:[%s3729_s8 + $0x8] sm:$0xff]  }
 0x326   : > { %v2512_v57 = vpop.f32.mrb[20].mxu0  ;;  %v2432_v29 = vpop.f32.mrb[11].mxu1  ;;  %p3089_p10 = pnand %p3088_p2, %p3082_p6 }
 0x327   : > { %v1693_v58 = vadd.f32 %v2458_v14, %v2430_v25  ;;  %v2513_v48 = vpop.f32.mrb[21].mxu0  ;;  %v2433_v17 = vadd.f32 %v2432_v29, %v2431_v55  ;;  %v1995_v25 = vunpack.c.l.bf16 %v2903_v12 }
 0x328   : > { %v2514_v26 = vadd.f32 %v2513_v48, %v2512_v57  ;;  %v2515_v30 = vpop.f32.mrb[22].mxu0 }
 0x329   : > { %v1696_v33 = vadd.f32 %v2461_v20, %v2433_v17  ;;  %v2516_v34 = vpop.f32.mrb[23].mxu0 }
 0x32a   : > { %v2517_v40 = vadd.f32 %v2516_v34, %v2515_v30  ;;  %v1996_v30 = vunpack.c.h.bf16 %v2903_v12 }
 0x33b   : > { %v2478_v43 = vpop.f32.mrb[12].mxu1 }
 0x33c   : > { %v2479_v41 = vpop.f32.mrb[13].mxu1 }
 0x33d   : > { %v2480_v15 = vadd.f32 %v2479_v41, %v2478_v43  ;;  %v2481_v44 = vpop.f32.mrb[14].mxu1 }
 0x33e   : > { %v2482_v42 = vpop.f32.mrb[15].mxu1 }
 0x33f   : > { %v1734_v56 = vadd.f32 %v2480_v15, %v1685_v35  ;;  %v2483_v63 = vadd.f32 %v2482_v42, %v2481_v44 }
 0x341   : > { %v1737_v46 = vadd.f32 %v2483_v63, %v1688_v61  ;;  %v1783_v49 = vadd.f32 %v2508_v38, %v1734_v56  ;;  %v2360_v38 = vld [vmem:[%s4300_s18] ss:$0 sm:$0xff] }
 0x343   : > { %v2484_v60 = vpop.f32.mrb[16].mxu1  ;;  %v1786_v8 = vadd.f32 %v2511_v53, %v1737_v46 }
 0x344   : > { %v2485_v24 = vpop.f32.mrb[17].mxu1 }
 0x345   : > { %v2486_v18 = vadd.f32 %v2485_v24, %v2484_v60  ;;  %v2487_v31 = vpop.f32.mrb[18].mxu1 }
 0x346   : > { %v2488_v39 = vpop.f32.mrb[19].mxu1 }
 0x347   : > { %v1742_v13 = vadd.f32 %v2486_v18, %v1693_v58  ;;  %v2489_v23 = vadd.f32 %v2488_v39, %v2487_v31  ;;  %v2904_v58 = vld [vmem:[%s3729_s8] sm:$0xff]   ;;  %s2364_s8 = sshll.u32 %s2026_s0, 6 }
 0x348   : > { %v1993_v48 = vunpack.c.l.bf16 %v2904_v58  ;;  %s4081_s7 = scalar_lea.hbm %s4302_s11, %s2364_s8 }
 0x349   : > { %v1745_v36 = vadd.f32 %v2489_v23, %v1696_v33  ;;  %v1791_v59 = vadd.f32 %v2514_v26, %v1742_v13 }
 0x34b   : > { %v1794_v0 = vadd.f32 %v2517_v40, %v1745_v36  ;;  %v1994_v40 = vunpack.c.h.bf16 %v2904_v58 }
 0x35b   : > { %v2616_v2 = vpop.f32.mrb[20].mxu1 }
 0x35c   : > { %v1840_v3 = vadd.f32 %v2616_v2, %v1791_v59  ;;  %v1831_v4 = vpop.f32.mrb[21].mxu1 }
 0x35d   : > { %v1832_v62 = vadd.f32 %v1831_v4, %v1783_v49  ;;  %v2617_v5 = vpop.f32.mrb[22].mxu1 }
 0x35e   : > { %v1854_v6 = vmul.f32 %v2349_v1, %v1840_v3  ;;  %v1843_v7 = vadd.f32 %v2617_v5, %v1794_v0  ;;  %v1834_v9 = vpop.f32.mrb[23].mxu1 }
 0x35f   : > { %v1852_v10 = vmul.f32 %v2349_v1, %v1832_v62  ;;  %v1835_v11 = vadd.f32 %v1834_v9, %v1786_v8 }
 0x360   : > { %v1864_v14 = vadd.f32 %v2350_v51, %v1854_v6  ;;  %v1855_v16 = vmul.f32 %v2349_v1, %v1843_v7 }
 0x361   : > { %v1862_v19 = vadd.f32 %v2350_v51, %v1852_v10  ;;  %v1853_v20 = vmul.f32 %v2349_v1, %v1835_v11 }
 0x362   : > { %v1865_v21 = vadd.f32 %v2350_v51, %v1855_v16  ;;  %v1868_v27 = vmax.f32 %v1864_v14, 0.0 }
 0x363   : > { %v1863_v22 = vadd.f32 %v2350_v51, %v1853_v20  ;;  %v1866_v32 = vmax.f32 %v1862_v19, 0.0 }
 0x364   : > { %v1869_v28 = vmax.f32 %v1865_v21, 0.0 }
 0x365   : > { %v1867_v50 = vmax.f32 %v1863_v22, 0.0 }
 0x366   : > { %v1871_v35 = vpack.c.bf16 %v1869_v28, %v1868_v27 }
 0x367   : > { %v1870_v37 = vpack.c.bf16 %v1867_v50, %v1866_v32 }
 0x369   : > { %2634 = vmatprep.mubr.bf16.mxu0 %v1870_v37 }
 0x36a   : > { %2635 = vmatmul.mubr.bf16.vlgmr.msra.gmra.mrb[24].mxu0 %v1871_v35 }
 0x43d   : > { %v2636_v45 = vpop.f32.mrb[24].mxu0 }
 0x43e   : > { %v1977_v61 = vmul.f32 %v2636_v45, %v2359_v52  ;;  %v1954_v47 = vpop.f32.mrb[25].mxu0 }
 0x43f   : > { %v1975_v53 = vmul.f32 %v2359_v52, %v1954_v47  ;;  %v2637_v54 = vpop.f32.mrb[26].mxu0 }
 0x440   : > { %v1987_v55 = vadd.f32 %v2360_v38, %v1977_v61  ;;  %v1978_v57 = vmul.f32 %v2637_v54, %v2359_v52  ;;  %v1957_v29 = vpop.f32.mrb[27].mxu0 }
 0x441   : > { %v1985_v17 = vadd.f32 %v2360_v38, %v1975_v53  ;;  %v1976_v26 = vmul.f32 %v2359_v52, %v1957_v29 }
 0x442   : > { %v1991_v33 = vmax.f32 %v1987_v55, 0.0  ;;  %v1988_v34 = vadd.f32 %v2360_v38, %v1978_v57 }
 0x443   : > { %v1989_v43 = vmax.f32 %v1985_v17, 0.0  ;;  %v1986_v41 = vadd.f32 %v2360_v38, %v1976_v26 }
 0x444   : > { %v1999_v15 = vadd.f32 %v1995_v25, %v1991_v33  ;;  %v1992_v44 = vmax.f32 %v1988_v34, 0.0 }
 0x445   : > { %v1997_v42 = vadd.f32 %v1993_v48, %v1989_v43  ;;  %v1990_v56 = vmax.f32 %v1986_v41, 0.0 }
 0x446   : > { %v2000_v63 = vadd.f32 %v1996_v30, %v1992_v44  ;;  %v2003_v49 = vmax.f32 %v1999_v15, 0.0 }
 0x447   : > { %v1998_v46 = vadd.f32 %v1994_v40, %v1990_v56  ;;  %v2001_v8 = vmax.f32 %v1997_v42, 0.0 }
 0x448   : > { %v2004_v60 = vmax.f32 %v2000_v63, 0.0 }
 0x449   : > { %v2002_v24 = vmax.f32 %v1998_v46, 0.0 }
 0x44a   : > { %v2375_v18 = vpack.c.bf16 %v2004_v60, %v2003_v49 }
 0x44b   : > { %v2370_v31 = vpack.c.bf16 %v2002_v24, %v2001_v8 }
 0x44c   : > { %2377 = vst [vmem:[%s596_s9 + $0x8] sm:$0xff] %v2375_v18  }
 0x44d   : > { %2371 = vst [vmem:[%s596_s9] sm:$0xff] %v2370_v31  }
 0x44e   : > { %3092 = shalt.err (!%p3089_p10)
}
 0x44f   : > { %s3093_s5 = scalar_lea.hbm %s4081_s7, 256  ;;  %s3097_s13 = scalar_lea.hbm %s4302_s11, 1024 }
 0x450   : > { %p3094_p11 = scmp.ne.s32.totalorder %s4081_s7, %s3093_s5  ;;  %p3098_p13 = scmp.lt.u32.totalorder %s4081_s7, %s4302_s11 }
 0x451   : > { %p3099_p1 = scmp.lt.u32.totalorder %s3097_s13, %s3093_s5  ;;  %p3101_p5 = scmp.lt.u32.totalorder %s3093_s5, %s4081_s7 }
 0x452   : > { %p3095_p4 = pnand %p3094_p11, %p4303_p9 }
 0x453   : > { %p3100_p3 = por %p3099_p1, %p3098_p13 }
 0x454   : > { %p3096_p12 = pneg %p3095_p4 }
 0x455   : > { %p3102_p8 = por %p3101_p5, %p3100_p3 }
 0x457   : > { %p3103_p6 = pnand %p3102_p8, %p3096_p12 }
 0x459   : > { %3106 = shalt.err (!%p3103_p6)
}
 0x45a   : > { %s3254_s0 = smov 64   ;;  %s3255_s8 = smov 4  }
 0x45b   : > { %2656 = dma.vmem_to_hbm [thread:$0]  (%p4303_p9), %s4083_s12, 256, %s4081_s7, %s2014_s2, %s3254_s0, %s3254_s0, %s3255_s8  }
 0x45c PF: > { %p2689_p7 = scmp.ge.s32.totalorder %s3241_s16, 2  ;;  %s2044_s9 = sand.u32 1, %s3213_s27  }
 0x45d   : > { %p4304_p0 = scmp.ne.s32.totalorder %s4247_s4, 0  ;;  %s2045_s24 = scalar_lea.sflag [#allocation4], %s2044_s9 }
 0x45f   : > { %p2679_p2 = pnand %p2689_p7, %p4304_p0 }
 0x461   : > { %3184 = dma.done.wait (!%p2679_p2), %s2045_s24, 256  }
 0x462   : > { %3186 = vsyncadd (!%p2679_p2), %s2045_s24, 4294967040  ;;  %s33_s16 = sadd.s32 1, %s3241_s16   ;;  %s4306_s10 = sld [smem:[#allocation21_spill]] }
 0x463   : > { %p4114_p10 = scmp.ge.s32.totalorder %s33_s16, 6   ;;  %s4307_s6 = sld [smem:[#allocation22_spill]] }
 0x464   : > { %s4308_s12 = smov %s4338_s21  ;;  %s4309_s24 = sld [smem:[#allocation23_spill]] }
 0x465   : > { %s4310_s7 = smov %s3586_s22  ;;  %s4311_s30 = sld [smem:[#allocation26_spill]] }
 0x466   : > { %s4312_s13 = sld [smem:[#allocation27_spill]]  ;;  %s4313_s14 = sld [smem:[#allocation29_spill]] }
 0x467   : > { %s4314_s15 = sld [smem:[#allocation30_spill]]  ;;  %s4317_s23 = smov %s4308_s12 }
 0x468   : > { %s4315_s21 = smov %s4306_s10  ;;  %s4318_s25 = smov %s3209_s26 }
 0x469   : > { %s4316_s22 = smov %s4307_s6  ;;  %s4319_s26 = smov %s3487_s20 }
 0x46a   : > { %s4320_s27 = smov %s3217_s28  ;;  %s4321_s28 = smov %s3221_s29 }
 0x46b   : > { %s4322_s29 = smov %s4310_s7  ;;  %32 = sbr.rel (!%p4114_p10) target bundleno = 28 (0x1c), region = 149 }
 0x472   :  { %2050 = vsyncpa [#allocation3], 1 }
 0x473   :  { %2052 = vsyncpa [#allocation3 + $0x1], 1 }
 0x474   :  { %2053 = vsyncpa [#allocation6], 1 }
 0x475   :  { %2055 = vsyncpa [#allocation6 + $0x1], 1 }
 0x476   :  { %2056 = vsyncpa [#allocation9], 1 }
 0x477   :  { %2057 = vsyncpa [#allocation12], 1 }
 0x478   :  { %2058 = vsyncpa [#allocation4], 1 }
 0x479   :  { %2060 = vsyncpa [#allocation4 + $0x1], 1 }

</bundles_post_ra>
